<compile_context>
chip_gen: v7x
topology: tpu7x:2x2x1
jax: 0.10.0
libtpu: 0.0.40
codegen_flags: <defaults>
</compile_context>

<pallas_src>
import functools

import numpy as np

import jax
import jax.numpy as jnp
from jax.experimental import pallas as pl
from jax.experimental.pallas import tpu as pltpu


# Static geometry (ConvNet.__init__ on a 28x28 single-channel input).
_H1, _W1 = 13, 13            # conv1 output spatial (28, k=5, s=2, p=1)
_H2, _W2 = 7, 7              # conv2 output spatial (13, k=3, s=2, p=1)
_P1, _P1P = _H1 * _W1, 176   # conv1 output pixels, padded to a multiple of 8
_P2, _P2P = _H2 * _W2, 56    # conv2 output pixels, padded to a multiple of 8
_K1 = 25                     # 5*5*1 conv1 patch length
_NC = 16                     # conv channel count
_T2 = 9                      # conv2 taps (3*3)
_NH3 = 100                   # lin3 width
_NO, _NOP = 10, 16           # lin4 width, padded for lane-dense stores


def _conv2_gather_matrix():
    """Constant 0/1 matrix G of shape (9*56, 176).

    Row t*56 + p2 selects, for conv2 output pixel p2=(oh,ow) and tap t=(i,j),
    the conv1 output pixel (2*oh+i-1, 2*ow+j-1), or all-zeros where that
    index falls in conv2's zero padding (and in the 169->176 / 49->56 pads).
    One MXU matmul G @ h1 then performs the whole strided-conv im2col for a
    full lane-batch of samples at once.
    """
    g = np.zeros((_T2, _P2P, _P1P), np.float32)
    for i in range(3):
        for j in range(3):
            t = i * 3 + j
            for oh in range(_H2):
                for ow in range(_W2):
                    r = 2 * oh + i - 1
                    c = 2 * ow + j - 1
                    if 0 <= r < _H1 and 0 <= c < _W1:
                        g[t, oh * _W2 + ow, r * _W1 + c] = 1.0
    return jnp.asarray(g.reshape(_T2 * _P2P, _P1P), jnp.bfloat16)


def _block_diag(w, n):
    """kron(I_n, w): per-lane-batch block-diagonal weight (bf16, exact)."""
    return jnp.kron(jnp.eye(n, dtype=w.dtype), w)


# ----------------------------------------------------------------------------
# Fused Pallas kernel: conv1 -> conv2 -> lin3 -> lin4 for nb*bbl samples
# ----------------------------------------------------------------------------
def _convnet_kernel(p1_ref, g_ref, w1_ref, b1_ref, w2_ref, b2_ref,
                    w3_ref, b3_ref, w4_ref, b4_ref, out_ref, *, nb, bbl):
    # p1_ref : (nb, 176, bbl*25) bf16  conv1 patches, lane-batch packed
    # g_ref  : (504, 176)        bf16  conv2 gather matrix (constant)
    # w*_ref : bf16 block-diagonal weights, b*_ref: (1, lanes) f32 biases
    # out_ref: (nb, 56, bbl*16)  bf16  lane-dense output slab
    L = bbl * _NC

    # conv1 over the WHOLE block: one MXU matmul, M = nb*176, N = bbl*16.
    p1 = p1_ref[...].reshape(nb * _P1P, bbl * _K1)      # leading-dim merge
    h1 = jnp.dot(p1, w1_ref[...], preferred_element_type=jnp.float32)
    h1 = jnp.maximum(h1 + b1_ref[...], 0.0).astype(jnp.bfloat16)

    g = g_ref[...]                                      # (504, 176)
    for n in range(nb):                                 # short static unroll
        h1n = h1[n * _P1P:(n + 1) * _P1P, :]            # 8-aligned slice

        # conv2 spatial gather: batch in the MXU lane dim (N = bbl*16).
        q = jnp.dot(g, h1n,
                    preferred_element_type=jnp.float32).astype(jnp.bfloat16)

        # conv2 tap weights: 9 matmuls (56, bbl*16) @ (bbl*16, bbl*16).
        acc = jnp.zeros((_P2P, L), jnp.float32)
        for t in range(_T2):
            acc = acc + jnp.dot(q[t * _P2P:(t + 1) * _P2P, :], w2_ref[t],
                                preferred_element_type=jnp.float32)
        h2 = jnp.maximum(acc + b2_ref[...], 0.0).astype(jnp.bfloat16)

        # lin3 / lin4 per-pixel over channels, still lane-batched.
        h3 = jnp.dot(h2, w3_ref[...], preferred_element_type=jnp.float32)
        h3 = jnp.maximum(h3 + b3_ref[...], 0.0).astype(jnp.bfloat16)
        h4 = jnp.dot(h3, w4_ref[...], preferred_element_type=jnp.float32)
        h4 = jnp.maximum(h4 + b4_ref[...], 0.0)

        # elementwise sigmoid: EUP exp + approx reciprocal (no VPU divide)
        h4 = pl.reciprocal(1.0 + jnp.exp(-h4), approx=True)

        out_ref[n] = h4.astype(out_ref.dtype)           # lane-dense store


# ----------------------------------------------------------------------------
# One-time parameter preparation (hoisted out of the jitted forward)
# ----------------------------------------------------------------------------
def prepare_params(params):
    w1 = jnp.transpose(params["conv1_w"], (2, 3, 1, 0)).reshape(_K1, _NC)
    w2 = jnp.transpose(params["conv2_w"], (2, 3, 1, 0)).reshape(_T2, _NC, _NC)
    return {
        "w1": w1.astype(jnp.bfloat16),                        # (25, 16)
        "b1": params["conv1_b"].astype(jnp.float32),          # (16,)
        "w2": w2.astype(jnp.bfloat16),                        # (9, 16, 16)
        "b2": params["conv2_b"].astype(jnp.float32),          # (16,)
        "w3": params["lin3_w"].T.astype(jnp.bfloat16),        # (16, 100)
        "b3": params["lin3_b"].astype(jnp.float32),           # (100,)
        "w4": params["lin4_w"].T.astype(jnp.bfloat16),        # (100, 10)
        "b4": params["lin4_b"].astype(jnp.float32),           # (10,)
        "g2": _conv2_gather_matrix(),                         # (504, 176)
    }


# ----------------------------------------------------------------------------
# Forward pass
# ----------------------------------------------------------------------------
def convnet_forward(x, prepped):
    B = x.shape[0]

    # Lane batch bbl (samples packed into MXU columns; bbl*16 <= 128) and
    # row batch nb (sample-groups per grid step).  Keep >= 2 grid steps when
    # possible so ("parallel",) actually splits work across v7x's two TCs.
    bbl = next(d for d in (8, 4, 2, 1) if B % d == 0)
    M = B // bbl
    nb = next((d for d in (4, 2, 1) if M % d == 0 and M // d >= 2), 1)
    L = bbl * _NC

    # conv1 im2col (k=5, s=2, p=1) -- thin XLA glue on the raw input, in bf16.
    # TODO(synk): move patch extraction fully in-kernel to cut input HBM
    # bytes a further ~2.7x (matters most on v5e/v6e).
    xi = x.reshape(B, 28, 28).astype(jnp.bfloat16)      # torch view(-1,1,28,28)
    xp = jnp.pad(xi, ((0, 0), (1, 1), (1, 1)))          # (B, 30, 30)
    cols = [xp[:, i:i + 2 * _H1:2, j:j + 2 * _W1:2]
            for i in range(5) for j in range(5)]
    p1 = jnp.stack(cols, axis=-1).reshape(B, _P1, _K1)
    p1 = jnp.pad(p1, ((0, 0), (0, _P1P - _P1), (0, 0)))           # (B,176,25)
    # pack the lane batch: (M, 176, bbl*25), [group, pixel, (sample, tap)]
    p1 = p1.reshape(M, bbl, _P1P, _K1).transpose(0, 2, 1, 3)
    p1 = p1.reshape(M, _P1P, bbl * _K1)

    # Batch-layout weights: block-diagonal over the lane batch (tiny, cheap;
    # rebuilt per call only because bbl depends on the batch size).
    w1bd = _block_diag(prepped["w1"], bbl)                        # (bbl*25, L)
    w2bd = jnp.stack([_block_diag(prepped["w2"][t], bbl)
                      for t in range(_T2)])                       # (9, L, L)
    w3bd = _block_diag(prepped["w3"], bbl)                        # (L, bbl*100)
    w4p = jnp.pad(prepped["w4"], ((0, 0), (0, _NOP - _NO)))       # (100, 16)
    w4bd = _block_diag(w4p, bbl)                                  # (bbl*100, L)
    b1t = jnp.tile(prepped["b1"], bbl)[None, :]                   # (1, L)
    b2t = jnp.tile(prepped["b2"], bbl)[None, :]                   # (1, L)
    b3t = jnp.tile(prepped["b3"], bbl)[None, :]                   # (1, bbl*100)
    b4t = jnp.tile(jnp.pad(prepped["b4"], (0, _NOP - _NO)), bbl)[None, :]

    out = pl.pallas_call(
        functools.partial(_convnet_kernel, nb=nb, bbl=bbl),
        grid=(M // nb,),
        in_specs=[
            pl.BlockSpec((nb, _P1P, bbl * _K1), lambda i: (i, 0, 0)),  # p1
            pl.BlockSpec((_T2 * _P2P, _P1P), lambda i: (0, 0)),        # G
            pl.BlockSpec((bbl * _K1, L), lambda i: (0, 0)),            # w1
            pl.BlockSpec((1, L), lambda i: (0, 0)),                    # b1
            pl.BlockSpec((_T2, L, L), lambda i: (0, 0, 0)),            # w2
            pl.BlockSpec((1, L), lambda i: (0, 0)),                    # b2
            pl.BlockSpec((L, bbl * _NH3), lambda i: (0, 0)),           # w3
            pl.BlockSpec((1, bbl * _NH3), lambda i: (0, 0)),           # b3
            pl.BlockSpec((bbl * _NH3, L), lambda i: (0, 0)),           # w4
            pl.BlockSpec((1, L), lambda i: (0, 0)),                    # b4
        ],
        out_specs=pl.BlockSpec((nb, _P2P, L), lambda i: (i, 0, 0)),
        out_shape=jax.ShapeDtypeStruct((M, _P2P, L), jnp.bfloat16),
        compiler_params=pltpu.CompilerParams(
            dimension_semantics=("parallel",)),
    )(p1, prepped["g2"], w1bd, b1t, w2bd, b2t, w3bd, b3t, w4bd, b4t)

    # Undo the lane-batch layout, drop pixel/channel padding, cast to f32.
    out = out.reshape(M, _P2P, bbl, _NOP).transpose(0, 2, 1, 3)
    out = out.reshape(B, _P2P, _NOP)[:, :_P2, :_NO].astype(jnp.float32)

    # Back to torch NCHW (B, 10, 7, 7), then view(-1, size(1)=10).
    out = jnp.transpose(out.reshape(B, _H2, _W2, _NO), (0, 3, 1, 2))
    return out.reshape(-1, out.shape[1])


# ----------------------------------------------------------------------------
# Pure-jnp f32 reference (same semantics) for the self-test
# ----------------------------------------------------------------------------
def convnet_forward_ref(x, params):
    B = x.shape[0]
    xi = x.reshape(B, 28, 28)
    xp = jnp.pad(xi, ((0, 0), (1, 1), (1, 1)))
    cols = [xp[:, i:i + 26:2, j:j + 26:2] for i in range(5) for j in range(5)]
    p1 = jnp.stack(cols, axis=-1).reshape(B * 169, 25)
    w1 = jnp.transpose(params["conv1_w"], (2, 3, 1, 0)).reshape(25, 16)
    h1 = jax.nn.relu(p1 @ w1 + params["conv1_b"]).reshape(B, 13, 13, 16)

    h1p = jnp.pad(h1, ((0, 0), (1, 1), (1, 1), (0, 0)))
    cols2 = [h1p[:, i:i + 14:2, j:j + 14:2, :]
             for i in range(3) for j in range(3)]
    p2 = jnp.stack(cols2, axis=3).reshape(B * 49, 144)
    w2 = jnp.transpose(params["conv2_w"], (2, 3, 1, 0)).reshape(144, 16)
    h2 = jax.nn.relu(p2 @ w2 + params["conv2_b"])

    h3 = jax.nn.relu(h2 @ params["lin3_w"].T + params["lin3_b"])
    h4 = jax.nn.relu(h3 @ params["lin4_w"].T + params["lin4_b"])
    h4 = jax.nn.sigmoid(h4)
    h4 = jnp.transpose(h4.reshape(B, 7, 7, 10), (0, 3, 1, 2))
    return h4.reshape(-1, h4.shape[1])


# ----------------------------------------------------------------------------
# Deterministic parameter init (shapes from ConvNet.__init__, torch layout)
# ----------------------------------------------------------------------------
def init_params(key):
    ks = jax.random.split(key, 8)
    s = 0.1
    return {
        "conv1_w": s * jax.random.normal(ks[0], (16, 1, 5, 5), jnp.float32),
        "conv1_b": s * jax.random.normal(ks[1], (16,), jnp.float32),
        "conv2_w": s * jax.random.normal(ks[2], (16, 16, 3, 3), jnp.float32),
        "conv2_b": s * jax.random.normal(ks[3], (16,), jnp.float32),
        "lin3_w": s * jax.random.normal(ks[4], (100, 16), jnp.float32),
        "lin3_b": s * jax.random.normal(ks[5], (100,), jnp.float32),
        "lin4_w": s * jax.random.normal(ks[6], (10, 100), jnp.float32),
        "lin4_b": s * jax.random.normal(ks[7], (10,), jnp.float32),
    }


if __name__ == "__main__":
    key = jax.random.PRNGKey(0)
    pkey, xkey = jax.random.split(key)
    params = init_params(pkey)
    prepped = prepare_params(params)        # one-time weight relayout / casts

    fwd = jax.jit(convnet_forward)

    # batch=2 exercises the tiny-batch path; batch=32 exercises the packed
    # lane-batch (bbl=8) + multi-step grid path.
    for batch in (2, 32):
        x = jax.random.normal(jax.random.fold_in(xkey, batch),
                              (batch, 784), jnp.float32)
        out = jax.block_until_ready(fwd(x, prepped))
        ref = convnet_forward_ref(x, params)
        assert out.shape == (batch * _P2, _NO), out.shape
        assert bool(jnp.all(jnp.isfinite(out)))
        max_err = float(jnp.max(jnp.abs(out - ref)))
        assert max_err < 6e-2, max_err      # bf16 matmul / f32 accum tolerance

    print("KERNEL_OK")
</pallas_src>

<mosaic_0001>
module attributes {stable_mosaic.version = 11 : i64} {
  func.func @_convnet_kernel(%arg0: i32, %arg1: memref<1x176x50xbf16, #tpu.memory_space<vmem>>, %arg2: memref<504x176xbf16, #tpu.memory_space<vmem>>, %arg3: memref<50x32xbf16, #tpu.memory_space<vmem>>, %arg4: memref<1x32xf32, #tpu.memory_space<vmem>>, %arg5: memref<9x32x32xbf16, #tpu.memory_space<vmem>>, %arg6: memref<1x32xf32, #tpu.memory_space<vmem>>, %arg7: memref<32x200xbf16, #tpu.memory_space<vmem>>, %arg8: memref<1x200xf32, #tpu.memory_space<vmem>>, %arg9: memref<200x32xbf16, #tpu.memory_space<vmem>>, %arg10: memref<1x32xf32, #tpu.memory_space<vmem>>, %arg11: memref<1x56x32xbf16, #tpu.memory_space<vmem>>) attributes {dimension_semantics = [#tpu.dimension_semantics<parallel>], iteration_bounds = array<i64: 1>, scalar_prefetch = 0 : i64, scratch_operands = 0 : i64, tpu.core_type = #tpu.core_type<tc>, window_params = [{transform_indices = @transform_0, window_bounds = array<i64: 1, 176, 50>}, {pipeline_mode = #tpu.pipeline_mode<synchronous>, transform_indices = @transform_1, window_bounds = array<i64: 504, 176>}, {pipeline_mode = #tpu.pipeline_mode<synchronous>, transform_indices = @transform_2, window_bounds = array<i64: 50, 32>}, {pipeline_mode = #tpu.pipeline_mode<synchronous>, transform_indices = @transform_3, window_bounds = array<i64: 1, 32>}, {pipeline_mode = #tpu.pipeline_mode<synchronous>, transform_indices = @transform_4, window_bounds = array<i64: 9, 32, 32>}, {pipeline_mode = #tpu.pipeline_mode<synchronous>, transform_indices = @transform_5, window_bounds = array<i64: 1, 32>}, {pipeline_mode = #tpu.pipeline_mode<synchronous>, transform_indices = @transform_6, window_bounds = array<i64: 32, 200>}, {pipeline_mode = #tpu.pipeline_mode<synchronous>, transform_indices = @transform_7, window_bounds = array<i64: 1, 200>}, {pipeline_mode = #tpu.pipeline_mode<synchronous>, transform_indices = @transform_8, window_bounds = array<i64: 200, 32>}, {pipeline_mode = #tpu.pipeline_mode<synchronous>, transform_indices = @transform_9, window_bounds = array<i64: 1, 32>}, {transform_indices = @transform_10, window_bounds = array<i64: 1, 56, 32>}]} {
    %c0 = arith.constant 0 : index
    %c0_0 = arith.constant 0 : index
    %c0_1 = arith.constant 0 : index
    %0 = vector.load %arg1[%c0, %c0_0, %c0_1] : memref<1x176x50xbf16, #tpu.memory_space<vmem>>, vector<1x176x50xbf16>
    %1 = vector.shape_cast %0 : vector<1x176x50xbf16> to vector<176x50xbf16>
    %c0_2 = arith.constant 0 : index
    %c0_3 = arith.constant 0 : index
    %2 = vector.load %arg3[%c0_2, %c0_3] : memref<50x32xbf16, #tpu.memory_space<vmem>>, vector<50x32xbf16>
    %cst = arith.constant dense<0.000000e+00> : vector<176x32xf32>
    %3 = tpu.matmul %1, %2, %cst {dimension_numbers = #tpu.dot_dimension_numbers<[1], [0], [0], [1], [0, 0, 1, 1], [], []>} : vector<176x50xbf16>, vector<50x32xbf16>, vector<176x32xf32> -> vector<176x32xf32>
    %c0_4 = arith.constant 0 : index
    %c0_5 = arith.constant 0 : index
    %4 = vector.load %arg4[%c0_4, %c0_5] : memref<1x32xf32, #tpu.memory_space<vmem>>, vector<1x32xf32>
    %5 = vector.broadcast %4 : vector<1x32xf32> to vector<176x32xf32>
    %6 = arith.addf %3, %5 : vector<176x32xf32>
    %cst_6 = arith.constant 0.000000e+00 : f32
    %7 = vector.broadcast %cst_6 : f32 to vector<176x32xf32>
    %8 = arith.maximumf %6, %7 : vector<176x32xf32>
    %9 = arith.truncf %8 : vector<176x32xf32> to vector<176x32xbf16>
    %c0_7 = arith.constant 0 : index
    %c0_8 = arith.constant 0 : index
    %10 = vector.load %arg2[%c0_7, %c0_8] : memref<504x176xbf16, #tpu.memory_space<vmem>>, vector<504x176xbf16>
    %cst_9 = arith.constant dense<0.000000e+00> : vector<504x32xf32>
    %11 = tpu.matmul %10, %9, %cst_9 {dimension_numbers = #tpu.dot_dimension_numbers<[1], [0], [0], [1], [0, 0, 1, 1], [], []>} : vector<504x176xbf16>, vector<176x32xbf16>, vector<504x32xf32> -> vector<504x32xf32>
    %12 = arith.truncf %11 : vector<504x32xf32> to vector<504x32xbf16>
    %cst_10 = arith.constant 0.000000e+00 : f32
    %13 = vector.broadcast %cst_10 : f32 to vector<56x32xf32>
    %14 = vector.extract_strided_slice %12 {offsets = [0, 0], sizes = [56, 32], strides = [1, 1]} : vector<504x32xbf16> to vector<56x32xbf16>
    %c0_11 = arith.constant 0 : index
    %c0_12 = arith.constant 0 : index
    %c0_13 = arith.constant 0 : index
    %15 = vector.load %arg5[%c0_11, %c0_12, %c0_13] : memref<9x32x32xbf16, #tpu.memory_space<vmem>>, vector<1x32x32xbf16>
    %16 = vector.shape_cast %15 : vector<1x32x32xbf16> to vector<32x32xbf16>
    %cst_14 = arith.constant dense<0.000000e+00> : vector<56x32xf32>
    %17 = tpu.matmul %14, %16, %cst_14 {dimension_numbers = #tpu.dot_dimension_numbers<[1], [0], [0], [1], [0, 0, 1, 1], [], []>} : vector<56x32xbf16>, vector<32x32xbf16>, vector<56x32xf32> -> vector<56x32xf32>
    %18 = arith.addf %13, %17 : vector<56x32xf32>
    %19 = vector.extract_strided_slice %12 {offsets = [56, 0], sizes = [56, 32], strides = [1, 1]} : vector<504x32xbf16> to vector<56x32xbf16>
    %c1 = arith.constant 1 : index
    %c0_15 = arith.constant 0 : index
    %c0_16 = arith.constant 0 : index
    %20 = vector.load %arg5[%c1, %c0_15, %c0_16] : memref<9x32x32xbf16, #tpu.memory_space<vmem>>, vector<1x32x32xbf16>
    %21 = vector.shape_cast %20 : vector<1x32x32xbf16> to vector<32x32xbf16>
    %cst_17 = arith.constant dense<0.000000e+00> : vector<56x32xf32>
    %22 = tpu.matmul %19, %21, %cst_17 {dimension_numbers = #tpu.dot_dimension_numbers<[1], [0], [0], [1], [0, 0, 1, 1], [], []>} : vector<56x32xbf16>, vector<32x32xbf16>, vector<56x32xf32> -> vector<56x32xf32>
    %23 = arith.addf %18, %22 : vector<56x32xf32>
    %24 = vector.extract_strided_slice %12 {offsets = [112, 0], sizes = [56, 32], strides = [1, 1]} : vector<504x32xbf16> to vector<56x32xbf16>
    %c2 = arith.constant 2 : index
    %c0_18 = arith.constant 0 : index
    %c0_19 = arith.constant 0 : index
    %25 = vector.load %arg5[%c2, %c0_18, %c0_19] : memref<9x32x32xbf16, #tpu.memory_space<vmem>>, vector<1x32x32xbf16>
    %26 = vector.shape_cast %25 : vector<1x32x32xbf16> to vector<32x32xbf16>
    %cst_20 = arith.constant dense<0.000000e+00> : vector<56x32xf32>
    %27 = tpu.matmul %24, %26, %cst_20 {dimension_numbers = #tpu.dot_dimension_numbers<[1], [0], [0], [1], [0, 0, 1, 1], [], []>} : vector<56x32xbf16>, vector<32x32xbf16>, vector<56x32xf32> -> vector<56x32xf32>
    %28 = arith.addf %23, %27 : vector<56x32xf32>
    %29 = vector.extract_strided_slice %12 {offsets = [168, 0], sizes = [56, 32], strides = [1, 1]} : vector<504x32xbf16> to vector<56x32xbf16>
    %c3 = arith.constant 3 : index
    %c0_21 = arith.constant 0 : index
    %c0_22 = arith.constant 0 : index
    %30 = vector.load %arg5[%c3, %c0_21, %c0_22] : memref<9x32x32xbf16, #tpu.memory_space<vmem>>, vector<1x32x32xbf16>
    %31 = vector.shape_cast %30 : vector<1x32x32xbf16> to vector<32x32xbf16>
    %cst_23 = arith.constant dense<0.000000e+00> : vector<56x32xf32>
    %32 = tpu.matmul %29, %31, %cst_23 {dimension_numbers = #tpu.dot_dimension_numbers<[1], [0], [0], [1], [0, 0, 1, 1], [], []>} : vector<56x32xbf16>, vector<32x32xbf16>, vector<56x32xf32> -> vector<56x32xf32>
    %33 = arith.addf %28, %32 : vector<56x32xf32>
    %34 = vector.extract_strided_slice %12 {offsets = [224, 0], sizes = [56, 32], strides = [1, 1]} : vector<504x32xbf16> to vector<56x32xbf16>
    %c4 = arith.constant 4 : index
    %c0_24 = arith.constant 0 : index
    %c0_25 = arith.constant 0 : index
    %35 = vector.load %arg5[%c4, %c0_24, %c0_25] : memref<9x32x32xbf16, #tpu.memory_space<vmem>>, vector<1x32x32xbf16>
    %36 = vector.shape_cast %35 : vector<1x32x32xbf16> to vector<32x32xbf16>
    %cst_26 = arith.constant dense<0.000000e+00> : vector<56x32xf32>
    %37 = tpu.matmul %34, %36, %cst_26 {dimension_numbers = #tpu.dot_dimension_numbers<[1], [0], [0], [1], [0, 0, 1, 1], [], []>} : vector<56x32xbf16>, vector<32x32xbf16>, vector<56x32xf32> -> vector<56x32xf32>
    %38 = arith.addf %33, %37 : vector<56x32xf32>
    %39 = vector.extract_strided_slice %12 {offsets = [280, 0], sizes = [56, 32], strides = [1, 1]} : vector<504x32xbf16> to vector<56x32xbf16>
    %c5 = arith.constant 5 : index
    %c0_27 = arith.constant 0 : index
    %c0_28 = arith.constant 0 : index
    %40 = vector.load %arg5[%c5, %c0_27, %c0_28] : memref<9x32x32xbf16, #tpu.memory_space<vmem>>, vector<1x32x32xbf16>
    %41 = vector.shape_cast %40 : vector<1x32x32xbf16> to vector<32x32xbf16>
    %cst_29 = arith.constant dense<0.000000e+00> : vector<56x32xf32>
    %42 = tpu.matmul %39, %41, %cst_29 {dimension_numbers = #tpu.dot_dimension_numbers<[1], [0], [0], [1], [0, 0, 1, 1], [], []>} : vector<56x32xbf16>, vector<32x32xbf16>, vector<56x32xf32> -> vector<56x32xf32>
    %43 = arith.addf %38, %42 : vector<56x32xf32>
    %44 = vector.extract_strided_slice %12 {offsets = [336, 0], sizes = [56, 32], strides = [1, 1]} : vector<504x32xbf16> to vector<56x32xbf16>
    %c6 = arith.constant 6 : index
    %c0_30 = arith.constant 0 : index
    %c0_31 = arith.constant 0 : index
    %45 = vector.load %arg5[%c6, %c0_30, %c0_31] : memref<9x32x32xbf16, #tpu.memory_space<vmem>>, vector<1x32x32xbf16>
    %46 = vector.shape_cast %45 : vector<1x32x32xbf16> to vector<32x32xbf16>
    %cst_32 = arith.constant dense<0.000000e+00> : vector<56x32xf32>
    %47 = tpu.matmul %44, %46, %cst_32 {dimension_numbers = #tpu.dot_dimension_numbers<[1], [0], [0], [1], [0, 0, 1, 1], [], []>} : vector<56x32xbf16>, vector<32x32xbf16>, vector<56x32xf32> -> vector<56x32xf32>
    %48 = arith.addf %43, %47 : vector<56x32xf32>
    %49 = vector.extract_strided_slice %12 {offsets = [392, 0], sizes = [56, 32], strides = [1, 1]} : vector<504x32xbf16> to vector<56x32xbf16>
    %c7 = arith.constant 7 : index
    %c0_33 = arith.constant 0 : index
    %c0_34 = arith.constant 0 : index
    %50 = vector.load %arg5[%c7, %c0_33, %c0_34] : memref<9x32x32xbf16, #tpu.memory_space<vmem>>, vector<1x32x32xbf16>
    %51 = vector.shape_cast %50 : vector<1x32x32xbf16> to vector<32x32xbf16>
    %cst_35 = arith.constant dense<0.000000e+00> : vector<56x32xf32>
    %52 = tpu.matmul %49, %51, %cst_35 {dimension_numbers = #tpu.dot_dimension_numbers<[1], [0], [0], [1], [0, 0, 1, 1], [], []>} : vector<56x32xbf16>, vector<32x32xbf16>, vector<56x32xf32> -> vector<56x32xf32>
    %53 = arith.addf %48, %52 : vector<56x32xf32>
    %54 = vector.extract_strided_slice %12 {offsets = [448, 0], sizes = [56, 32], strides = [1, 1]} : vector<504x32xbf16> to vector<56x32xbf16>
    %c8 = arith.constant 8 : index
    %c0_36 = arith.constant 0 : index
    %c0_37 = arith.constant 0 : index
    %55 = vector.load %arg5[%c8, %c0_36, %c0_37] : memref<9x32x32xbf16, #tpu.memory_space<vmem>>, vector<1x32x32xbf16>
    %56 = vector.shape_cast %55 : vector<1x32x32xbf16> to vector<32x32xbf16>
    %cst_38 = arith.constant dense<0.000000e+00> : vector<56x32xf32>
    %57 = tpu.matmul %54, %56, %cst_38 {dimension_numbers = #tpu.dot_dimension_numbers<[1], [0], [0], [1], [0, 0, 1, 1], [], []>} : vector<56x32xbf16>, vector<32x32xbf16>, vector<56x32xf32> -> vector<56x32xf32>
    %58 = arith.addf %53, %57 : vector<56x32xf32>
    %c0_39 = arith.constant 0 : index
    %c0_40 = arith.constant 0 : index
    %59 = vector.load %arg6[%c0_39, %c0_40] : memref<1x32xf32, #tpu.memory_space<vmem>>, vector<1x32xf32>
    %60 = vector.broadcast %59 : vector<1x32xf32> to vector<56x32xf32>
    %61 = arith.addf %58, %60 : vector<56x32xf32>
    %cst_41 = arith.constant 0.000000e+00 : f32
    %62 = vector.broadcast %cst_41 : f32 to vector<56x32xf32>
    %63 = arith.maximumf %61, %62 : vector<56x32xf32>
    %64 = arith.truncf %63 : vector<56x32xf32> to vector<56x32xbf16>
    %c0_42 = arith.constant 0 : index
    %c0_43 = arith.constant 0 : index
    %65 = vector.load %arg7[%c0_42, %c0_43] : memref<32x200xbf16, #tpu.memory_space<vmem>>, vector<32x200xbf16>
    %cst_44 = arith.constant dense<0.000000e+00> : vector<56x200xf32>
    %66 = tpu.matmul %64, %65, %cst_44 {dimension_numbers = #tpu.dot_dimension_numbers<[1], [0], [0], [1], [0, 0, 1, 1], [], []>} : vector<56x32xbf16>, vector<32x200xbf16>, vector<56x200xf32> -> vector<56x200xf32>
    %c0_45 = arith.constant 0 : index
    %c0_46 = arith.constant 0 : index
    %67 = vector.load %arg8[%c0_45, %c0_46] : memref<1x200xf32, #tpu.memory_space<vmem>>, vector<1x200xf32>
    %68 = vector.broadcast %67 : vector<1x200xf32> to vector<56x200xf32>
    %69 = arith.addf %66, %68 : vector<56x200xf32>
    %cst_47 = arith.constant 0.000000e+00 : f32
    %70 = vector.broadcast %cst_47 : f32 to vector<56x200xf32>
    %71 = arith.maximumf %69, %70 : vector<56x200xf32>
    %72 = arith.truncf %71 : vector<56x200xf32> to vector<56x200xbf16>
    %c0_48 = arith.constant 0 : index
    %c0_49 = arith.constant 0 : index
    %73 = vector.load %arg9[%c0_48, %c0_49] : memref<200x32xbf16, #tpu.memory_space<vmem>>, vector<200x32xbf16>
    %cst_50 = arith.constant dense<0.000000e+00> : vector<56x32xf32>
    %74 = tpu.matmul %72, %73, %cst_50 {dimension_numbers = #tpu.dot_dimension_numbers<[1], [0], [0], [1], [0, 0, 1, 1], [], []>} : vector<56x200xbf16>, vector<200x32xbf16>, vector<56x32xf32> -> vector<56x32xf32>
    %c0_51 = arith.constant 0 : index
    %c0_52 = arith.constant 0 : index
    %75 = vector.load %arg10[%c0_51, %c0_52] : memref<1x32xf32, #tpu.memory_space<vmem>>, vector<1x32xf32>
    %76 = vector.broadcast %75 : vector<1x32xf32> to vector<56x32xf32>
    %77 = arith.addf %74, %76 : vector<56x32xf32>
    %cst_53 = arith.constant 0.000000e+00 : f32
    %78 = vector.broadcast %cst_53 : f32 to vector<56x32xf32>
    %79 = arith.maximumf %77, %78 : vector<56x32xf32>
    %cst_54 = arith.constant 0.000000e+00 : f32
    %80 = vector.broadcast %cst_54 : f32 to vector<56x32xf32>
    %81 = arith.subf %80, %79 : vector<56x32xf32>
    %82 = math.exp %81 : vector<56x32xf32>
    %cst_55 = arith.constant 1.000000e+00 : f32
    %83 = vector.broadcast %cst_55 : f32 to vector<56x32xf32>
    %84 = arith.addf %83, %82 : vector<56x32xf32>
    %85 = tpu.reciprocal %84 {approx = true} : vector<56x32xf32> -> vector<56x32xf32>
    %86 = arith.truncf %85 : vector<56x32xf32> to vector<56x32xbf16>
    %c0_56 = arith.constant 0 : index
    %c0_57 = arith.constant 0 : index
    %c0_58 = arith.constant 0 : index
    %87 = vector.load %arg11[%c0_56, %c0_57, %c0_58] : memref<1x56x32xbf16, #tpu.memory_space<vmem>>, vector<1x56x32xbf16>
    %88 = vector.shape_cast %87 : vector<1x56x32xbf16> to vector<56x32xbf16>
    %89 = vector.shape_cast %86 : vector<56x32xbf16> to vector<1x56x32xbf16>
    tpu.vector_store %arg11[%c0_56, %c0_57, %c0_58], %89 {strides = array<i32>} : memref<1x56x32xbf16, #tpu.memory_space<vmem>>, vector<1x56x32xbf16>,
    return
  }
  func.func @transform_0(%arg0: i32) -> (i32, i32, i32) {
    %c0_i32 = arith.constant 0 : i32
    %c0_i32_0 = arith.constant 0 : i32
    %c0_i32_1 = arith.constant 0 : i32
    return %arg0, %c0_i32, %c0_i32_0 : i32, i32, i32
  }
  func.func @transform_1(%arg0: i32) -> (i32, i32) {
    %c0_i32 = arith.constant 0 : i32
    %c0_i32_0 = arith.constant 0 : i32
    %c0_i32_1 = arith.constant 0 : i32
    return %c0_i32, %c0_i32_0 : i32, i32
  }
  func.func @transform_2(%arg0: i32) -> (i32, i32) {
    %c0_i32 = arith.constant 0 : i32
    %c0_i32_0 = arith.constant 0 : i32
    %c0_i32_1 = arith.constant 0 : i32
    return %c0_i32, %c0_i32_0 : i32, i32
  }
  func.func @transform_3(%arg0: i32) -> (i32, i32) {
    %c0_i32 = arith.constant 0 : i32
    %c0_i32_0 = arith.constant 0 : i32
    %c0_i32_1 = arith.constant 0 : i32
    return %c0_i32, %c0_i32_0 : i32, i32
  }
  func.func @transform_4(%arg0: i32) -> (i32, i32, i32) {
    %c0_i32 = arith.constant 0 : i32
    %c0_i32_0 = arith.constant 0 : i32
    %c0_i32_1 = arith.constant 0 : i32
    %c0_i32_2 = arith.constant 0 : i32
    return %c0_i32, %c0_i32_0, %c0_i32_1 : i32, i32, i32
  }
  func.func @transform_5(%arg0: i32) -> (i32, i32) {
    %c0_i32 = arith.constant 0 : i32
    %c0_i32_0 = arith.constant 0 : i32
    %c0_i32_1 = arith.constant 0 : i32
    return %c0_i32, %c0_i32_0 : i32, i32
  }
  func.func @transform_6(%arg0: i32) -> (i32, i32) {
    %c0_i32 = arith.constant 0 : i32
    %c0_i32_0 = arith.constant 0 : i32
    %c0_i32_1 = arith.constant 0 : i32
    return %c0_i32, %c0_i32_0 : i32, i32
  }
  func.func @transform_7(%arg0: i32) -> (i32, i32) {
    %c0_i32 = arith.constant 0 : i32
    %c0_i32_0 = arith.constant 0 : i32
    %c0_i32_1 = arith.constant 0 : i32
    return %c0_i32, %c0_i32_0 : i32, i32
  }
  func.func @transform_8(%arg0: i32) -> (i32, i32) {
    %c0_i32 = arith.constant 0 : i32
    %c0_i32_0 = arith.constant 0 : i32
    %c0_i32_1 = arith.constant 0 : i32
    return %c0_i32, %c0_i32_0 : i32, i32
  }
  func.func @transform_9(%arg0: i32) -> (i32, i32) {
    %c0_i32 = arith.constant 0 : i32
    %c0_i32_0 = arith.constant 0 : i32
    %c0_i32_1 = arith.constant 0 : i32
    return %c0_i32, %c0_i32_0 : i32, i32
  }
  func.func @transform_10(%arg0: i32) -> (i32, i32, i32) {
    %c0_i32 = arith.constant 0 : i32
    %c0_i32_0 = arith.constant 0 : i32
    %c0_i32_1 = arith.constant 0 : i32
    return %arg0, %c0_i32, %c0_i32_0 : i32, i32, i32
  }
}

</mosaic_0001>

<bundles_post_ra>
// kernel: tile.38
= control target key start
LH: loop header
LB: loop body
LE: loop exit
PB: predicated region body
PF: predicated region fallthrough
CT: control target
= control target key end

     0   :  { %s22_s0 = inlined_call_operand.vmem [shape: f32[16], index: 0, kind: input, shape index: {}]   ;;  %s23_s1 = inlined_call_operand.vmem [shape: f32[2,16], index: 1, kind: output, shape index: {}]  }
   0x1   :  { %v4_v0 = vld [vmem:[%s22_s0] ss:$0 sm:$0xff] }
   0x2   :  { %5 = vst [vmem:[%s23_s1] sm:$0x3] %v4_v0 }

// kernel: tile.33
= control target key start
LH: loop header
LB: loop body
LE: loop exit
PB: predicated region body
PF: predicated region fallthrough
CT: control target
= control target key end

     0   :  { %s22_s0 = inlined_call_operand.vmem [shape: f32[100], index: 0, kind: input, shape index: {}]   ;;  %s23_s1 = inlined_call_operand.vmem [shape: f32[2,100], index: 1, kind: output, shape index: {}]  }
   0x1   :  { %v4_v0 = vld [vmem:[%s22_s0] ss:$0 sm:$0xff] }
   0x2   :  { %5 = vst [vmem:[%s23_s1] sm:$0x3] %v4_v0 }

// kernel: tile.34
= control target key start
LH: loop header
LB: loop body
LE: loop exit
PB: predicated region body
PF: predicated region fallthrough
CT: control target
= control target key end

     0   :  { %vm13_vm0 = vcmask 228352   ;;  %vm7_vm1 = vcmask 818176   ;;  %vm17_vm2 = vcmask 588800   ;;  %vm20_vm3 = vcmask 1048352   ;;  %s55_s0 = inlined_call_operand.vmem [shape: f32[2,100], index: 0, kind: input, shape index: {}]   ;;  %s56_s1 = inlined_call_operand.vmem [shape: f32[1,200], index: 1, kind: output, shape index: {}]  }
   0x1   :  { %v4_v0 = vld [vmem:[%s55_s0] sm:$0x3]  ;;  %s35_s0 = smov 100  }
   0x2   :  { %5 = vst [vmem:[#allocation1] sm:$0x3] %v4_v0 }
   0x9   :  { %v10_v1 = vld [vmem:[#allocation1 + $0x1] sm:$0x1]   ;;  %v6_v3 = vld [vmem:[#allocation1] sm:$0x1]  }
   0xa   :  { %v12_v2 = vld [vmem:[#allocation1 + $0x1] sm:$0x1]   ;;  %8 = vst.msk [vmem:[#allocation0] sm:$0x1] %vm7_vm1, %v6_v3  }
   0xb   :  { %v14_v4 = vsel %vm13_vm0, %v12_v2, %v10_v1 }
   0xc   :  { %15 = vrot.lane.b32.xlu0 %v14_v4, %s35_s0 }
  0x7e   :  { %v16_v5 = vpop.permute.xlu0 %15  }
  0x7f   :  { %19 = vst.msk [vmem:[#allocation0 + $0x8] sm:$0x1] %vm17_vm2, %v16_v5  }
  0x80   :  { %21 = vst.msk [vmem:[#allocation0] sm:$0x1] %vm20_vm3, %v16_v5  }
  0x86   :  { %v29_v7 = vld [vmem:[#allocation0 + $0x8] sm:$0x1] }
  0x87   :  { %v25_v6 = vld [vmem:[#allocation0] sm:$0x1]  ;;  %33 = vst [vmem:[%s56_s1 + $0x1] sm:$0x1] %v29_v7 }
  0x88   :  { %27 = vst [vmem:[%s56_s1] sm:$0x1] %v25_v6 }

// kernel: tile.39
= control target key start
LH: loop header
LB: loop body
LE: loop exit
PB: predicated region body
PF: predicated region fallthrough
CT: control target
= control target key end

     0   :  { %vm7_vm0 = vcmask 130048   ;;  %vm13_vm1 = vcmask 261248   ;;  %s39_s0 = inlined_call_operand.vmem [shape: f32[2,16], index: 0, kind: input, shape index: {}]   ;;  %s40_s1 = inlined_call_operand.vmem [shape: f32[1,32], index: 1, kind: output, shape index: {}]  }
   0x1   :  { %v4_v0 = vld [vmem:[%s39_s0] sm:$0x3]  ;;  %s22_s0 = smov 16  }
   0x2   :  { %5 = vst [vmem:[#allocation1] sm:$0x3] %v4_v0 }
   0x9   :  { %v10_v1 = vld [vmem:[#allocation1 + $0x1] sm:$0x1]   ;;  %v6_v2 = vld [vmem:[#allocation1] sm:$0x1]  }
   0xa   :  { %11 = vrot.lane.b32.xlu0 %v10_v1, %s22_s0  ;;  %8 = vst.msk [vmem:[#allocation0] sm:$0x1] %vm7_vm0, %v6_v2  }
  0x7c   :  { %v12_v3 = vpop.permute.xlu0 %11  }
  0x7d   :  { %14 = vst.msk [vmem:[#allocation0] sm:$0x1] %vm13_vm1, %v12_v3  }
  0x84   :  { %v18_v4 = vld [vmem:[#allocation0] sm:$0x1] }
  0x85   :  { %20 = vst [vmem:[%s40_s1] sm:$0x1] %v18_v4 }

// kernel: convnet_forward.1
= control target key start
LH: loop header
LB: loop body
LE: loop exit
PB: predicated region body
PF: predicated region fallthrough
CT: control target
= control target key end

     0   :  { %v3162_v0 = vmov 0.0   ;;  %vm3163_vm0 = vmmov 0   ;;  %vm182_vm1 = vcmask 1040384   ;;  %vm148_vm2 = vcmask 408576   ;;  %s3778_s2 = inlined_call_operand.vmem [shape: bf16[50,32], index: 2, kind: input, shape index: {}]   ;;  %s3779_s0 = inlined_call_operand.vmem [shape: bf16[1,176,50], index: 0, kind: input, shape index: {}]   ;;  %s3780_s1 = inlined_call_operand.vmem [shape: bf16[504,176], index: 1, kind: input, shape index: {}]   ;;  %s3781_s3 = inlined_call_operand.vmem [shape: f32[1,32], index: 3, kind: input, shape index: {}]   ;;  %s3782_s4 = inlined_call_operand.vmem [shape: bf16[9,32,32], index: 4, kind: input, shape index: {}]   ;;  %s3783_s6 = inlined_call_operand.vmem [shape: bf16[32,200], index: 6, kind: input, shape index: {}]   ;;  %s3784_s8 = inlined_call_operand.vmem [shape: bf16[200,32], index: 8, kind: input, shape index: {}]   ;;  %s3785_s5 = inlined_call_operand.vmem [shape: f32[1,32], index: 5, kind: input, shape index: {}]   ;;  %s3786_s7 = inlined_call_operand.vmem [shape: f32[1,200], index: 7, kind: input, shape index: {}]   ;;  %s3787_s9 = inlined_call_operand.vmem [shape: f32[1,32], index: 9, kind: input, shape index: {}]   ;;  %s3788_s10 = inlined_call_operand.vmem [shape: bf16[1,56,32], index: 10, kind: output, shape index: {}]  }
   0x1   :  { %2792 = vmatprep.subr.bf16.mxu0 %v3162_v0  ;;  %v2987_v1 = vld [vmem:[%s3778_s2] sm:$0xff]   ;;  %2800 = vmatprep.mubr.msk.bf16.mxu0 %vm3163_vm0, %v3162_v0  ;;  %v2988_v2 = vld [vmem:[%s3778_s2 + $0x8] sm:$0xff]   ;;  %v2990_v3 = vld [vmem:[%s3778_s2 + $0x18] ss:$0 sps:$4 sm:$0x11]   ;;  %v3164_v17 = vmov 0  }
   0x2   :  { %2793 = vmatpush3.bf16.msra.mxu0 %v2987_v1  ;;  %v2989_v4 = vld [vmem:[%s3778_s2 + $0x10] sm:$0xff]   ;;  %v184_v5 = vsel %vm182_vm1, %v2990_v3, 0  ;;  %v2991_v6 = vld [vmem:[%s3779_s0] sm:$0xff]   ;;  %v2992_v7 = vld [vmem:[%s3779_s0 + $0x8] sm:$0xff]   ;;  %785 = vmatprep.subr.bf16.mxu1 %v3164_v17  ;;  %vm688_vm3 = vcmask 392192   ;;  %vm1138_vm4 = vcmask 261120  }
   0x3   :  { %2794 = vmatprep.subr.bf16.mxu0 %v3162_v0  ;;  %v2993_v8 = vld [vmem:[%s3779_s0 + $0x10] sm:$0xff]   ;;  %v2994_v9 = vld [vmem:[%s3779_s0 + $0x18] sm:$0xff]   ;;  %v2995_v10 = vld [vmem:[%s3779_s0 + $0x20] sm:$0xff]   ;;  %vm1118_vm5 = vcmask 1043456   ;;  %vm2309_vm6 = vcmask 588800   ;;  %vm2461_vm7 = vcmask 257024  }
   0x4   :  { %v2996_v11 = vld [vmem:[%s3779_s0 + $0x28] sm:$0xff]   ;;  %v2997_v12 = vld [vmem:[%s3779_s0 + $0x30] sm:$0xff]   ;;  %v2998_v13 = vld [vmem:[%s3779_s0 + $0x38] sm:$0xff]  }
   0x5   :  { %v2999_v14 = vld [vmem:[%s3779_s0 + $0x40] sm:$0xff]   ;;  %v3000_v15 = vld [vmem:[%s3779_s0 + $0x48] sm:$0xff]   ;;  %v3001_v16 = vld [vmem:[%s3779_s0 + $0x50] sm:$0xff]  }
   0x6   :  { %2795 = vmatpush3.bf16.msra.mxu0 %v2988_v2  ;;  %v3004_v18 = vld [vmem:[%s3780_s1 + $0x4] ss:$8 sps:$4 sm:$0xff]   ;;  %v3295_v19 = vld [vmem:[%s3781_s3] ss:$0 sm:$0xff] }
   0x7   :  { %2796 = vmatprep.subr.bf16.mxu0 %v3162_v0  ;;  %2564 = vmatprep.mubr.msk.bf16.mxu1 %vm688_vm3, %v3004_v18 }
   0xa   :  { %2797 = vmatpush3.bf16.msra.mxu0 %v2989_v4 }
   0xb   :  { %2798 = vmatprep.subr.bf16.mxu0 %v3162_v0 }
   0xe   :  { %2799 = vmatpush3.bf16.msra.mxu0 %v184_v5 }
  0x11   :  { %2801 = vmatmul.mubr.msk.bf16.vlgmr.msra.gmra.mrb[0].mxu0 %vm148_vm2, %v2991_v6 }
  0x12   :  { %2804 = vmatprep.mubr.msk.bf16.mxu0 %vm3163_vm0, %v3162_v0 }
  0x19   :  { %2805 = vmatmul.mubr.msk.bf16.gmra.mrb[4].mxu0 %vm148_vm2, %v2992_v7 }
  0x1a   :  { %2808 = vmatprep.mubr.msk.bf16.mxu0 %vm3163_vm0, %v3162_v0 }
  0x21   :  { %2809 = vmatmul.mubr.msk.bf16.gmra.mrb[8].mxu0 %vm148_vm2, %v2993_v8 }
  0x22   :  { %2812 = vmatprep.mubr.msk.bf16.mxu0 %vm3163_vm0, %v3162_v0 }
  0x29   :  { %2813 = vmatmul.mubr.msk.bf16.gmra.mrb[12].mxu0 %vm148_vm2, %v2994_v9 }
  0x2a   :  { %2816 = vmatprep.mubr.msk.bf16.mxu0 %vm3163_vm0, %v3162_v0 }
  0x31   :  { %2817 = vmatmul.mubr.msk.bf16.gmra.mrb[16].mxu0 %vm148_vm2, %v2995_v10 }
  0x32   :  { %2820 = vmatprep.mubr.msk.bf16.mxu0 %vm3163_vm0, %v3162_v0 }
  0x39   :  { %2821 = vmatmul.mubr.msk.bf16.gmra.mrb[20].mxu0 %vm148_vm2, %v2996_v11 }
  0x3a   :  { %2824 = vmatprep.mubr.msk.bf16.mxu0 %vm3163_vm0, %v3162_v0 }
  0x41   :  { %2825 = vmatmul.mubr.msk.bf16.gmra.mrb[24].mxu0 %vm148_vm2, %v2997_v12 }
  0x42   :  { %2828 = vmatprep.mubr.msk.bf16.mxu0 %vm3163_vm0, %v3162_v0 }
  0x49   :  { %2829 = vmatmul.mubr.msk.bf16.gmra.mrb[28].mxu0 %vm148_vm2, %v2998_v13 }
  0x4a   :  { %2832 = vmatprep.mubr.msk.bf16.mxu0 %vm3163_vm0, %v3162_v0 }
  0x51   :  { %2833 = vmatmul.mubr.msk.bf16.gmra.mrb[32].mxu0 %vm148_vm2, %v2999_v14 }
  0x52   :  { %2836 = vmatprep.mubr.msk.bf16.mxu0 %vm3163_vm0, %v3162_v0 }
  0x59   :  { %2837 = vmatmul.mubr.msk.bf16.gmra.mrb[36].mxu0 %vm148_vm2, %v3000_v15 }
  0x5a   :  { %2840 = vmatprep.mubr.msk.bf16.mxu0 %vm3163_vm0, %v3162_v0 }
  0x61   :  { %2841 = vmatmul.mubr.msk.bf16.gmra.mrb[40].mxu0 %vm148_vm2, %v3001_v16 }
  0xe4   :  { %v220_v20 = vpop.f32.mrb[0].mxu0 }
  0xe5   :  { %v221_v21 = vadd.f32 %v3295_v19, %v220_v20  ;;  %v2802_v22 = vpop.f32.mrb[1].mxu0 }
  0xe6   :  { %v223_v23 = vpop.f32.mrb[2].mxu0 }
  0xe7   :  { %v224_v24 = vadd.f32 %v3295_v19, %v223_v23  ;;  %v2803_v25 = vpop.f32.mrb[3].mxu0  ;;  %v307_v26 = vmax.f32 %v221_v21, 0.0 }
  0xe9   :  { %v308_v27 = vmax.f32 %v224_v24, 0.0 }
  0xeb   :  { %v329_v28 = vpack.c.bf16 %v308_v27, %v307_v26 }
  0xec   :  { %v228_v29 = vpop.f32.mrb[4].mxu0 }
  0xed   :  { %v229_v30 = vadd.f32 %v3295_v19, %v228_v29  ;;  %v2806_v31 = vpop.f32.mrb[5].mxu0  ;;  %786 = vmatpush1.bf16.msra.mxu1 %v329_v28 }
  0xee   :  { %v231_v32 = vpop.f32.mrb[6].mxu0  ;;  %787 = vmatprep.subr.bf16.mxu1 %v3164_v17 }
  0xef   :  { %v232_v33 = vadd.f32 %v3295_v19, %v231_v32  ;;  %v2807_v34 = vpop.f32.mrb[7].mxu0  ;;  %v309_v35 = vmax.f32 %v229_v30, 0.0 }
  0xf1   :  { %v310_v36 = vmax.f32 %v232_v33, 0.0 }
  0xf3   :  { %v330_v37 = vpack.c.bf16 %v310_v36, %v309_v35 }
  0xf4   :  { %v236_v38 = vpop.f32.mrb[8].mxu0 }
  0xf5   :  { %v237_v39 = vadd.f32 %v3295_v19, %v236_v38  ;;  %v2810_v40 = vpop.f32.mrb[9].mxu0  ;;  %788 = vmatpush1.bf16.msra.mxu1 %v330_v37 }
  0xf6   :  { %v239_v41 = vpop.f32.mrb[10].mxu0  ;;  %789 = vmatprep.subr.bf16.mxu1 %v3164_v17 }
  0xf7   :  { %v240_v42 = vadd.f32 %v3295_v19, %v239_v41  ;;  %v2811_v43 = vpop.f32.mrb[11].mxu0  ;;  %v311_v44 = vmax.f32 %v237_v39, 0.0 }
  0xf9   :  { %v312_v45 = vmax.f32 %v240_v42, 0.0 }
  0xfb   :  { %v331_v46 = vpack.c.bf16 %v312_v45, %v311_v44 }
  0xfc   :  { %v244_v47 = vpop.f32.mrb[12].mxu0 }
  0xfd   :  { %v245_v48 = vadd.f32 %v3295_v19, %v244_v47  ;;  %v2814_v49 = vpop.f32.mrb[13].mxu0  ;;  %790 = vmatpush1.bf16.msra.mxu1 %v331_v46 }
  0xfe   :  { %v247_v50 = vpop.f32.mrb[14].mxu0  ;;  %791 = vmatprep.subr.bf16.mxu1 %v3164_v17 }
  0xff   :  { %v248_v51 = vadd.f32 %v3295_v19, %v247_v50  ;;  %v2815_v52 = vpop.f32.mrb[15].mxu0  ;;  %v313_v53 = vmax.f32 %v245_v48, 0.0 }
 0x101   :  { %v314_v54 = vmax.f32 %v248_v51, 0.0 }
 0x103   :  { %v332_v55 = vpack.c.bf16 %v314_v54, %v313_v53 }
 0x104   :  { %v252_v56 = vpop.f32.mrb[16].mxu0 }
 0x105   :  { %v253_v57 = vadd.f32 %v3295_v19, %v252_v56  ;;  %v2818_v58 = vpop.f32.mrb[17].mxu0  ;;  %792 = vmatpush1.bf16.msra.mxu1 %v332_v55 }
 0x106   :  { %v255_v59 = vpop.f32.mrb[18].mxu0  ;;  %793 = vmatprep.subr.bf16.mxu1 %v3164_v17  ;;  %v3005_v58 = vld [vmem:[%s3780_s1 + $0x14] ss:$8 sps:$4 sm:$0xff]  }
 0x107   :  { %v256_v60 = vadd.f32 %v3295_v19, %v255_v59  ;;  %v2819_v61 = vpop.f32.mrb[19].mxu0  ;;  %v315_v62 = vmax.f32 %v253_v57, 0.0  ;;  %v3002_v57 = vld [vmem:[%s3780_s1] ss:$8 sps:$4 sm:$0xff]   ;;  %v3008_v59 = vld [vmem:[%s3780_s1 + $0x24] ss:$8 sps:$4 sm:$0xff]  }
 0x108   :  { %v3011_v61 = vld [vmem:[%s3780_s1 + $0x34] ss:$8 sps:$4 sm:$0xff]  }
 0x109   :  { %v316_v63 = vmax.f32 %v256_v60, 0.0  ;;  %v3010_v60 = vld [vmem:[%s3780_s1 + $0x20] ss:$8 sps:$4 sm:$0xff]  }
 0x10b   :  { %v333_v0 = vpack.c.bf16 %v316_v63, %v315_v62  ;;  %v3013_v62 = vld [vmem:[%s3780_s1 + $0x30] ss:$8 sps:$4 sm:$0xff]   ;;  %v3014_v63 = vld [vmem:[%s3780_s1 + $0x44] ss:$8 sps:$4 sm:$0xff]  }
 0x10c   :  { %v260_v1 = vpop.f32.mrb[20].mxu0 }
 0x10d   :  { %v261_v2 = vadd.f32 %v3295_v19, %v260_v1  ;;  %v2822_v3 = vpop.f32.mrb[21].mxu0  ;;  %794 = vmatpush1.bf16.msra.mxu1 %v333_v0  ;;  %v3016_v0 = vld [vmem:[%s3780_s1 + $0x40] ss:$8 sps:$4 sm:$0xff]   ;;  %v3017_v1 = vld [vmem:[%s3780_s1 + $0x54] ss:$8 sps:$4 sm:$0xff]  }
 0x10e   :  { %v263_v4 = vpop.f32.mrb[22].mxu0  ;;  %795 = vmatprep.subr.bf16.mxu1 %v3164_v17  ;;  %v3020_v3 = vld [vmem:[%s3780_s1 + $0x64] ss:$8 sps:$4 sm:$0xff]  }
 0x10f   :  { %v264_v5 = vadd.f32 %v3295_v19, %v263_v4  ;;  %v2823_v6 = vpop.f32.mrb[23].mxu0  ;;  %v317_v7 = vmax.f32 %v261_v2, 0.0  ;;  %v3019_v2 = vld [vmem:[%s3780_s1 + $0x50] ss:$8 sps:$4 sm:$0xff]   ;;  %v3022_v4 = vld [vmem:[%s3780_s1 + $0x60] ss:$8 sps:$4 sm:$0xff]  }
 0x110   :  { %v3025_v6 = vld [vmem:[%s3780_s1 + $0x70] ss:$8 sps:$4 sm:$0xff]  }
 0x111   :  { %v318_v8 = vmax.f32 %v264_v5, 0.0  ;;  %v3023_v5 = vld [vmem:[%s3780_s1 + $0x74] ss:$8 sps:$4 sm:$0xff]  }
 0x113   :  { %v334_v9 = vpack.c.bf16 %v318_v8, %v317_v7  ;;  %v3026_v7 = vld [vmem:[%s3780_s1 + $0x84] ss:$8 sps:$4 sm:$0xff]   ;;  %v3074_v8 = vld [vmem:[%s3782_s4 + $0x10] sm:$0xff]  }
 0x114   :  { %v268_v10 = vpop.f32.mrb[24].mxu0 }
 0x115   :  { %v269_v11 = vadd.f32 %v3295_v19, %v268_v10  ;;  %v2826_v12 = vpop.f32.mrb[25].mxu0  ;;  %796 = vmatpush1.bf16.msra.mxu1 %v334_v9  ;;  %v3028_v9 = vld [vmem:[%s3780_s1 + $0x80] ss:$8 sps:$4 sm:$0xff]   ;;  %v3029_v10 = vld [vmem:[%s3780_s1 + $0x94] ss:$8 sps:$4 sm:$0xff]  }
 0x116   :  { %v271_v13 = vpop.f32.mrb[26].mxu0  ;;  %797 = vmatprep.subr.bf16.mxu1 %v3164_v17  ;;  %v3032_v12 = vld [vmem:[%s3780_s1 + $0xa4] ss:$8 sps:$4 sm:$0xff]  }
 0x117   :  { %v272_v14 = vadd.f32 %v3295_v19, %v271_v13  ;;  %v2827_v15 = vpop.f32.mrb[27].mxu0  ;;  %v319_v16 = vmax.f32 %v269_v11, 0.0  ;;  %v3031_v11 = vld [vmem:[%s3780_s1 + $0x90] ss:$8 sps:$4 sm:$0xff]   ;;  %v3034_v13 = vld [vmem:[%s3780_s1 + $0xa0] ss:$8 sps:$4 sm:$0xff]  }
 0x118   :  { %v3037_v15 = vld [vmem:[%s3780_s1 + $0xb0] ss:$8 sps:$4 sm:$0xff]  }
 0x119   :  { %v320_v18 = vmax.f32 %v272_v14, 0.0  ;;  %v3035_v14 = vld [vmem:[%s3780_s1 + $0xb4] ss:$8 sps:$4 sm:$0xff]  }
 0x11b   :  { %v335_v20 = vpack.c.bf16 %v320_v18, %v319_v16  ;;  %v3038_v16 = vld [vmem:[%s3780_s1 + $0xc4] ss:$8 sps:$4 sm:$0xff]  }
 0x11c   :  { %v276_v21 = vpop.f32.mrb[28].mxu0  ;;  %v3087_v18 = vld [vmem:[%s3782_s4] sm:$0xff]  }
 0x11d   :  { %v277_v22 = vadd.f32 %v3295_v19, %v276_v21  ;;  %v2830_v23 = vpop.f32.mrb[29].mxu0  ;;  %798 = vmatpush1.bf16.msra.mxu1 %v335_v20  ;;  %2856 = vmatprep.subr.bf16.mxu0 %v3087_v18  ;;  %v3088_v20 = vld [vmem:[%s3782_s4 + $0x8] sm:$0xff]  }
 0x11e   :  { %v279_v24 = vpop.f32.mrb[30].mxu0  ;;  %799 = vmatprep.subr.bf16.mxu1 %v3164_v17  ;;  %2857 = vmatpush3.bf16.msra.mxu0 %v3087_v18  ;;  %v3040_v21 = vld [vmem:[%s3780_s1 + $0xc0] ss:$8 sps:$4 sm:$0xff]   ;;  %v3043_v23 = vld [vmem:[%s3780_s1 + $0xd0] ss:$8 sps:$4 sm:$0xff]  }
 0x11f   :  { %v280_v25 = vadd.f32 %v3295_v19, %v279_v24  ;;  %v2831_v26 = vpop.f32.mrb[31].mxu0  ;;  %v321_v27 = vmax.f32 %v277_v22, 0.0  ;;  %2858 = vmatprep.subr.bf16.mxu0 %v3088_v20  ;;  %v3041_v22 = vld [vmem:[%s3780_s1 + $0xd4] ss:$8 sps:$4 sm:$0xff]   ;;  %v3044_v24 = vld [vmem:[%s3780_s1 + $0xe4] ss:$8 sps:$4 sm:$0xff]  }
 0x120   :  { %v3047_v26 = vld [vmem:[%s3780_s1 + $0xf4] ss:$8 sps:$4 sm:$0xff]  }
 0x121   :  { %v322_v28 = vmax.f32 %v280_v25, 0.0  ;;  %v3046_v25 = vld [vmem:[%s3780_s1 + $0xe0] ss:$8 sps:$4 sm:$0xff]  }
 0x122   :  { %2859 = vmatpush3.bf16.msra.mxu0 %v3088_v20 }
 0x123   :  { %v336_v29 = vpack.c.bf16 %v322_v28, %v321_v27  ;;  %v3049_v27 = vld [vmem:[%s3780_s1 + $0xf0] ss:$8 sps:$4 sm:$0xff]   ;;  %v3050_v28 = vld [vmem:[%s3780_s1 + $0x104] ss:$8 sps:$4 sm:$0xff]  }
 0x124   :  { %v284_v30 = vpop.f32.mrb[32].mxu0 }
 0x125   :  { %v285_v31 = vadd.f32 %v3295_v19, %v284_v30  ;;  %v2834_v32 = vpop.f32.mrb[33].mxu0  ;;  %800 = vmatpush1.bf16.msra.mxu1 %v336_v29  ;;  %v3052_v29 = vld [vmem:[%s3780_s1 + $0x100] ss:$8 sps:$4 sm:$0xff]   ;;  %v3053_v30 = vld [vmem:[%s3780_s1 + $0x114] ss:$8 sps:$4 sm:$0xff]  }
 0x126   :  { %v287_v33 = vpop.f32.mrb[34].mxu0  ;;  %801 = vmatprep.subr.bf16.mxu1 %v3164_v17  ;;  %v3055_v32 = vld [vmem:[%s3780_s1 + $0x110] ss:$8 sps:$4 sm:$0xff]  }
 0x127   :  { %v288_v34 = vadd.f32 %v3295_v19, %v287_v33  ;;  %v2835_v35 = vpop.f32.mrb[35].mxu0  ;;  %v323_v36 = vmax.f32 %v285_v31, 0.0  ;;  %v3100_v31 = vld [vmem:[%s3782_s4 + $0x18] sm:$0xff]   ;;  %v3056_v33 = vld [vmem:[%s3780_s1 + $0x124] ss:$8 sps:$4 sm:$0xff]  }
 0x128   :  { %v3059_v35 = vld [vmem:[%s3780_s1 + $0x134] ss:$8 sps:$4 sm:$0xff]  }
 0x129   :  { %v324_v37 = vmax.f32 %v288_v34, 0.0  ;;  %v3058_v34 = vld [vmem:[%s3780_s1 + $0x120] ss:$8 sps:$4 sm:$0xff]  }
 0x12b   :  { %v337_v38 = vpack.c.bf16 %v324_v37, %v323_v36  ;;  %v3101_v36 = vld [vmem:[%s3782_s4 + $0x20] sm:$0xff]   ;;  %v3061_v37 = vld [vmem:[%s3780_s1 + $0x130] ss:$8 sps:$4 sm:$0xff]  }
 0x12c   :  { %v292_v39 = vpop.f32.mrb[36].mxu0  ;;  %2868 = vmatprep.subr.bf16.mxu0 %v3101_v36 }
 0x12d   :  { %v293_v40 = vadd.f32 %v3295_v19, %v292_v39  ;;  %v2838_v41 = vpop.f32.mrb[37].mxu0  ;;  %802 = vmatpush1.bf16.msra.mxu1 %v337_v38  ;;  %v3062_v38 = vld [vmem:[%s3780_s1 + $0x144] ss:$8 sps:$4 sm:$0xff]   ;;  %v3064_v39 = vld [vmem:[%s3780_s1 + $0x140] ss:$8 sps:$4 sm:$0xff]  }
 0x12e   :  { %v295_v42 = vpop.f32.mrb[38].mxu0  ;;  %803 = vmatprep.subr.bf16.mxu1 %v3164_v17  ;;  %v3067_v41 = vld [vmem:[%s3780_s1 + $0x150] ss:$8 sps:$4 sm:$0xff]  }
 0x12f   :  { %v296_v43 = vadd.f32 %v3295_v19, %v295_v42  ;;  %v2839_v44 = vpop.f32.mrb[39].mxu0  ;;  %v325_v45 = vmax.f32 %v293_v40, 0.0  ;;  %v3065_v40 = vld [vmem:[%s3780_s1 + $0x154] ss:$8 sps:$4 sm:$0xff]   ;;  %v3068_v42 = vld [vmem:[%s3780_s1 + $0x164] ss:$8 sps:$4 sm:$0xff]  }
 0x130   :  { %v3071_v44 = vld [vmem:[%s3780_s1 + $0x174] ss:$8 sps:$4 sm:$0xff]  }
 0x131   :  { %v326_v46 = vmax.f32 %v296_v43, 0.0  ;;  %v3070_v43 = vld [vmem:[%s3780_s1 + $0x160] ss:$8 sps:$4 sm:$0xff]  }
 0x133   :  { %v338_v47 = vpack.c.bf16 %v326_v46, %v325_v45  ;;  %v3073_v45 = vld [vmem:[%s3780_s1 + $0x170] ss:$8 sps:$4 sm:$0xff]   ;;  %v3075_v46 = vld [vmem:[%s3780_s1 + $0x184] ss:$8 sps:$4 sm:$0xff]  }
 0x134   :  { %v300_v48 = vpop.f32.mrb[40].mxu0 }
 0x135   :  { %v301_v49 = vadd.f32 %v3295_v19, %v300_v48  ;;  %v2842_v50 = vpop.f32.mrb[41].mxu0  ;;  %804 = vmatpush1.bf16.msra.mxu1 %v338_v47  ;;  %v3077_v47 = vld [vmem:[%s3780_s1 + $0x180] ss:$8 sps:$4 sm:$0xff]   ;;  %v3078_v48 = vld [vmem:[%s3780_s1 + $0x194] ss:$8 sps:$4 sm:$0xff]  }
 0x136   :  { %v303_v51 = vpop.f32.mrb[42].mxu0  ;;  %805 = vmatprep.subr.bf16.mxu1 %v3164_v17  ;;  %v3081_v50 = vld [vmem:[%s3780_s1 + $0x1a4] ss:$8 sps:$4 sm:$0xff]  }
 0x137   :  { %v304_v52 = vadd.f32 %v3295_v19, %v303_v51  ;;  %v2843_v53 = vpop.f32.mrb[43].mxu0  ;;  %v327_v54 = vmax.f32 %v301_v49, 0.0  ;;  %v3007_v19 = vld [vmem:[%s3780_s1 + $0x10] ss:$8 sps:$4 sm:$0xff]   ;;  %v3083_v51 = vld [vmem:[%s3780_s1 + $0x1a0] ss:$8 sps:$4 sm:$0xff]  }
 0x138   :  { %v3080_v49 = vld [vmem:[%s3780_s1 + $0x190] ss:$8 sps:$4 sm:$0xff]  }
 0x139   :  { %v328_v55 = vmax.f32 %v304_v52, 0.0  ;;  %v3084_v52 = vld [vmem:[%s3780_s1 + $0x1b4] ss:$8 sps:$4 sm:$0xff]  }
 0x13b   :  { %v339_v56 = vpack.c.bf16 %v328_v55, %v327_v54  ;;  %v3086_v55 = vld [vmem:[%s3780_s1 + $0x1b0] ss:$8 sps:$4 sm:$0xff]  }
 0x13d   :  { %806 = vmatpush1.bf16.msra.mxu1 %v339_v56 }
 0x13e   :  { %2844 = vmatprep.subr.bf16.mxu1 %v3074_v8 }
 0x140   :  { %818 = vmatmul.mubr.bf16.vlgmr.msra.gmra.mrb[0].mxu1 %v3002_v57  ;;  %v3089_v57 = vld [vmem:[%s3780_s1 + $0x1c4] ss:$8 sps:$4 sm:$0xff]  }
 0x141   :  { %2565 = vmatprep.mubr.msk.bf16.mxu1 %vm688_vm3, %v3005_v58  ;;  %2845 = vmatpush3.bf16.msra.mxu1 %v3074_v8  ;;  %v3095_v8 = vld [vmem:[%s3780_s1 + $0x1e4] ss:$8 sps:$4 sm:$0xff]  }
 0x142   :  { %2846 = vmatprep.subr.bf16.mxu1 %v3100_v31 }
 0x145   :  { %2847 = vmatpush3.bf16.msra.mxu1 %v3100_v31 }
 0x148   :  { %826 = vmatmul.mubr.bf16.gmra.mrb[4].mxu1 %v3007_v19 }
 0x149   :  { %2566 = vmatprep.mubr.msk.bf16.mxu1 %vm688_vm3, %v3008_v59 }
 0x150   :  { %834 = vmatmul.mubr.bf16.gmra.mrb[8].mxu1 %v3010_v60 }
 0x151   :  { %2567 = vmatprep.mubr.msk.bf16.mxu1 %vm688_vm3, %v3011_v61  ;;  %v3091_v61 = vld [vmem:[%s3780_s1 + $0x1c0] ss:$8 sps:$4 sm:$0xff]  }
 0x158   :  { %842 = vmatmul.mubr.bf16.gmra.mrb[12].mxu1 %v3013_v62 }
 0x159   :  { %2568 = vmatprep.mubr.msk.bf16.mxu1 %vm688_vm3, %v3014_v63  ;;  %v3092_v63 = vld [vmem:[%s3780_s1 + $0x1d4] ss:$8 sps:$4 sm:$0xff]  }
 0x160   :  { %850 = vmatmul.mubr.bf16.gmra.mrb[16].mxu1 %v3016_v0 }
 0x161   :  { %2569 = vmatprep.mubr.msk.bf16.mxu1 %vm688_vm3, %v3017_v1 }
 0x168   :  { %858 = vmatmul.mubr.bf16.gmra.mrb[20].mxu1 %v3019_v2  ;;  %v3102_v2 = vld [vmem:[%s3782_s4 + $0x28] sm:$0xff]  }
 0x169   :  { %2570 = vmatprep.mubr.msk.bf16.mxu1 %vm688_vm3, %v3020_v3  ;;  %v3555_v3 = vld [vmem:[%s3782_s4 + $0x30] sm:$0xff]  }
 0x170   :  { %866 = vmatmul.mubr.bf16.gmra.mrb[24].mxu1 %v3022_v4 }
 0x171   :  { %2571 = vmatprep.mubr.msk.bf16.mxu1 %vm688_vm3, %v3023_v5 }
 0x178   :  { %874 = vmatmul.mubr.bf16.gmra.mrb[28].mxu1 %v3025_v6  ;;  %v3094_v6 = vld [vmem:[%s3780_s1 + $0x1d0] ss:$8 sps:$4 sm:$0xff]  }
 0x179   :  { %2572 = vmatprep.mubr.msk.bf16.mxu1 %vm688_vm3, %v3026_v7 }
 0x180   :  { %882 = vmatmul.mubr.bf16.gmra.mrb[32].mxu1 %v3028_v9 }
 0x181   :  { %2573 = vmatprep.mubr.msk.bf16.mxu1 %vm688_vm3, %v3029_v10 }
 0x188   :  { %890 = vmatmul.mubr.bf16.gmra.mrb[36].mxu1 %v3031_v11  ;;  %v402_v11 = vld [vmem:[%s3780_s1 + $0x1f0] sm:$0xff] }
 0x189   :  { %2574 = vmatprep.mubr.msk.bf16.mxu1 %vm688_vm3, %v3032_v12 }
 0x190   :  { %898 = vmatmul.mubr.bf16.gmra.mrb[40].mxu1 %v3034_v13 }
 0x191   :  { %2575 = vmatprep.mubr.msk.bf16.mxu1 %vm688_vm3, %v3035_v14  ;;  %v3097_v14 = vld [vmem:[%s3780_s1 + $0x1e0] ss:$8 sps:$4 sm:$0xff]  }
 0x198   :  { %906 = vmatmul.mubr.bf16.gmra.mrb[44].mxu1 %v3037_v15 }
 0x199   :  { %2576 = vmatprep.mubr.msk.bf16.mxu1 %vm688_vm3, %v3038_v16  ;;  %v2563_v16 = vcombine.high %v402_v11, %v402_v11 }
 0x1a0   :  { %914 = vmatmul.mubr.bf16.gmra.mrb[48].mxu1 %v3040_v21 }
 0x1a1   :  { %2577 = vmatprep.mubr.msk.bf16.mxu1 %vm688_vm3, %v3041_v22 }
 0x1a8   :  { %922 = vmatmul.mubr.bf16.gmra.mrb[52].mxu1 %v3043_v23  ;;  %v2562_v23 = vcombine.low %v402_v11, %v402_v11 }
 0x1a9   :  { %2578 = vmatprep.mubr.msk.bf16.mxu1 %vm688_vm3, %v3044_v24 }
 0x1b0   :  { %930 = vmatmul.mubr.bf16.gmra.mrb[56].mxu1 %v3046_v25 }
 0x1b1   :  { %2579 = vmatprep.mubr.msk.bf16.mxu1 %vm688_vm3, %v3047_v26 }
 0x1b8   :  { %938 = vmatmul.mubr.bf16.gmra.mrb[60].mxu1 %v3049_v27 }
 0x1b9   :  { %2580 = vmatprep.mubr.msk.bf16.mxu1 %vm688_vm3, %v3050_v28 }
 0x1c0   :  { %946 = vmatmul.mubr.bf16.gmra.mrb[64].mxu1 %v3052_v29 }
 0x1c1   :  { %2581 = vmatprep.mubr.msk.bf16.mxu1 %vm688_vm3, %v3053_v30 }
 0x1c8   :  { %954 = vmatmul.mubr.bf16.gmra.mrb[68].mxu1 %v3055_v32 }
 0x1c9   :  { %2582 = vmatprep.mubr.msk.bf16.mxu1 %vm688_vm3, %v3056_v33 }
 0x1d0   :  { %962 = vmatmul.mubr.bf16.gmra.mrb[72].mxu1 %v3058_v34 }
 0x1d1   :  { %2583 = vmatprep.mubr.msk.bf16.mxu1 %vm688_vm3, %v3059_v35 }
 0x1d8   :  { %970 = vmatmul.mubr.bf16.gmra.mrb[76].mxu1 %v3061_v37 }
 0x1d9   :  { %2584 = vmatprep.mubr.msk.bf16.mxu1 %vm688_vm3, %v3062_v38 }
 0x1e0   :  { %978 = vmatmul.mubr.bf16.gmra.mrb[80].mxu1 %v3064_v39 }
 0x1e1   :  { %2585 = vmatprep.mubr.msk.bf16.mxu1 %vm688_vm3, %v3065_v40 }
 0x1e8   :  { %986 = vmatmul.mubr.bf16.gmra.mrb[84].mxu1 %v3067_v41 }
 0x1e9   :  { %2586 = vmatprep.mubr.msk.bf16.mxu1 %vm688_vm3, %v3068_v42 }
 0x1f0   :  { %994 = vmatmul.mubr.bf16.gmra.mrb[88].mxu1 %v3070_v43 }
 0x1f1   :  { %2587 = vmatprep.mubr.msk.bf16.mxu1 %vm688_vm3, %v3071_v44 }
 0x1f8   :  { %1002 = vmatmul.mubr.bf16.gmra.mrb[92].mxu1 %v3073_v45 }
 0x1f9   :  { %2588 = vmatprep.mubr.msk.bf16.mxu1 %vm688_vm3, %v3075_v46 }
 0x200   :  { %1010 = vmatmul.mubr.bf16.gmra.mrb[96].mxu1 %v3077_v47 }
 0x201   :  { %2589 = vmatprep.mubr.msk.bf16.mxu1 %vm688_vm3, %v3078_v48 }
 0x208   :  { %1018 = vmatmul.mubr.bf16.gmra.mrb[100].mxu1 %v3080_v49 }
 0x209   :  { %2590 = vmatprep.mubr.msk.bf16.mxu1 %vm688_vm3, %v3081_v50 }
 0x210   :  { %1026 = vmatmul.mubr.bf16.gmra.mrb[104].mxu1 %v3083_v51 }
 0x211   :  { %2591 = vmatprep.mubr.msk.bf16.mxu1 %vm688_vm3, %v3084_v52 }
 0x213   :  { %v819_v53 = vpop.f32.mrb[0].mxu1 }
 0x214   :  { %v821_v54 = vpop.f32.mrb[1].mxu1 }
 0x215   :  { %v822_v56 = vpop.f32.mrb[2].mxu1  ;;  %v3104_v54 = vld [vmem:[%s3782_s4 + $0x38] sm:$0xff]  }
 0x216   :  { %v1073_v58 = vpack.c.bf16 %v822_v56, %v819_v53  ;;  %v824_v19 = vpop.f32.mrb[3].mxu1 }
 0x218   :  { %1034 = vmatmul.mubr.bf16.gmra.mrb[108].mxu1 %v3086_v55  ;;  %2860 = vmatprep.mubr.msk.bf16.mxu0 %vm1138_vm4, %v1073_v58  ;;  %v3105_v55 = vld [vmem:[%s3782_s4 + $0x40] sm:$0xff]  }
 0x219   :  { %2592 = vmatprep.mubr.msk.bf16.mxu1 %vm688_vm3, %v3089_v57 }
 0x21b   :  { %v827_v59 = vpop.f32.mrb[4].mxu1 }
 0x21c   :  { %v829_v60 = vpop.f32.mrb[5].mxu1 }
 0x21d   :  { %v830_v62 = vpop.f32.mrb[6].mxu1 }
 0x21e   :  { %v1074_v0 = vpack.c.bf16 %v830_v62, %v827_v59  ;;  %v832_v1 = vpop.f32.mrb[7].mxu1 }
 0x220   :  { %1042 = vmatmul.mubr.bf16.gmra.mrb[112].mxu1 %v3091_v61  ;;  %2861 = vmatmul.mubr.msk.bf16.vlgmr.msra.gmra.mrb[44].mxu0 %vm1138_vm4, %v1074_v0 }
 0x221   :  { %2593 = vmatprep.mubr.msk.bf16.mxu1 %vm688_vm3, %v3092_v63  ;;  %2869 = vmatpush3.bf16.msra.mxu0 %v3101_v36 }
 0x222   :  { %2870 = vmatprep.subr.bf16.mxu0 %v3102_v2 }
 0x223   :  { %v835_v4 = vpop.f32.mrb[8].mxu1 }
 0x224   :  { %v837_v5 = vpop.f32.mrb[9].mxu1 }
 0x225   :  { %v838_v7 = vpop.f32.mrb[10].mxu1  ;;  %2871 = vmatpush3.bf16.msra.mxu0 %v3102_v2 }
 0x226   :  { %v1075_v9 = vpack.c.bf16 %v838_v7, %v835_v4  ;;  %v840_v10 = vpop.f32.mrb[11].mxu1  ;;  %2880 = vmatprep.subr.bf16.mxu0 %v3555_v3 }
 0x228   :  { %1050 = vmatmul.mubr.bf16.gmra.mrb[116].mxu1 %v3094_v6  ;;  %2864 = vmatprep.mubr.msk.bf16.mxu0 %vm1138_vm4, %v1075_v9 }
 0x229   :  { %2594 = vmatprep.mubr.msk.bf16.mxu1 %vm688_vm3, %v3095_v8 }
 0x22b   :  { %v843_v12 = vpop.f32.mrb[12].mxu1 }
 0x22c   :  { %v845_v13 = vpop.f32.mrb[13].mxu1 }
 0x22d   :  { %v846_v15 = vpop.f32.mrb[14].mxu1 }
 0x22e   :  { %v1076_v18 = vpack.c.bf16 %v846_v15, %v843_v12  ;;  %v848_v20 = vpop.f32.mrb[15].mxu1  ;;  %v3106_v15 = vld [vmem:[%s3782_s4 + $0x48] sm:$0xff]  }
 0x230   :  { %1058 = vmatmul.mubr.bf16.gmra.mrb[120].mxu1 %v3097_v14  ;;  %2865 = vmatmul.mubr.msk.bf16.gmra.mrb[48].mxu0 %vm1138_vm4, %v1076_v18  ;;  %v1119_v27 = vrot.slane %v1076_v18, 4 }
 0x231   :  { %2595 = vmatprep.mubr.msk.bf16.mxu1 %vm688_vm3, %v2563_v16 }
 0x233   :  { %v851_v21 = vpop.f32.mrb[16].mxu1 }
 0x234   :  { %v853_v22 = vpop.f32.mrb[17].mxu1 }
 0x235   :  { %v854_v24 = vpop.f32.mrb[18].mxu1  ;;  %v3107_v22 = vld [vmem:[%s3782_s4 + $0x50] sm:$0xff]  }
 0x236   :  { %v1077_v25 = vpack.c.bf16 %v854_v24, %v851_v21  ;;  %v856_v26 = vpop.f32.mrb[19].mxu1 }
 0x238   :  { %v1120_v28 = vrot.slane %v1077_v25, 4  ;;  %1066 = vmatmul.mubr.bf16.gmra.mrb[124].mxu1 %v2562_v23 }
 0x23a   :  { %v1121_v29 = vsel %vm1118_vm5, %v1119_v27, %v1120_v28 }
 0x23b   :  { %v859_v30 = vpop.f32.mrb[20].mxu1  ;;  %2848 = vmatprep.mubr.msk.bf16.mxu1 %vm1138_vm4, %v1121_v29 }
 0x23c   :  { %v861_v31 = vpop.f32.mrb[21].mxu1 }
 0x23d   :  { %v862_v32 = vpop.f32.mrb[22].mxu1 }
 0x23e   :  { %v1078_v33 = vpack.c.bf16 %v862_v32, %v859_v30  ;;  %v864_v34 = vpop.f32.mrb[23].mxu1 }
 0x240   :  { %v1122_v35 = vrot.slane %v1078_v33, 4 }
 0x242   :  { %v1123_v36 = vsel %vm1118_vm5, %v1120_v28, %v1122_v35 }
 0x243   :  { %v867_v37 = vpop.f32.mrb[24].mxu1  ;;  %2849 = vmatmul.mubr.msk.bf16.vlgmr.msra.gmra.mrb[128].mxu1 %vm1138_vm4, %v1123_v36 }
 0x244   :  { %v869_v38 = vpop.f32.mrb[25].mxu1 }
 0x245   :  { %v870_v39 = vpop.f32.mrb[26].mxu1  ;;  %v3109_v38 = vld [vmem:[%s3782_s4 + $0x60] sm:$0xff]  }
 0x246   :  { %v1079_v40 = vpack.c.bf16 %v870_v39, %v867_v37  ;;  %v872_v41 = vpop.f32.mrb[27].mxu1  ;;  %v3108_v37 = vld [vmem:[%s3782_s4 + $0x58] sm:$0xff]  }
 0x248   :  { %v1124_v42 = vrot.slane %v1079_v40, 4 }
 0x24a   :  { %v1125_v43 = vsel %vm1118_vm5, %v1122_v35, %v1124_v42 }
 0x24b   :  { %v875_v44 = vpop.f32.mrb[28].mxu1  ;;  %2852 = vmatprep.mubr.msk.bf16.mxu1 %vm1138_vm4, %v1125_v43 }
 0x24c   :  { %v877_v45 = vpop.f32.mrb[29].mxu1  ;;  %2853 = vmatmul.mubr.msk.bf16.gmra.mrb[132].mxu1 %vm1138_vm4, %v1124_v42 }
 0x24d   :  { %v878_v46 = vpop.f32.mrb[30].mxu1 }
 0x24e   :  { %v1080_v47 = vpack.c.bf16 %v878_v46, %v875_v44  ;;  %v880_v48 = vpop.f32.mrb[31].mxu1 }
 0x250   :  { %2872 = vmatprep.mubr.msk.bf16.mxu0 %vm1138_vm4, %v1080_v47 }
 0x253   :  { %v883_v49 = vpop.f32.mrb[32].mxu1 }
 0x254   :  { %v885_v50 = vpop.f32.mrb[33].mxu1 }
 0x255   :  { %v886_v51 = vpop.f32.mrb[34].mxu1 }
 0x256   :  { %v1081_v52 = vpack.c.bf16 %v886_v51, %v883_v49  ;;  %v888_v53 = vpop.f32.mrb[35].mxu1 }
 0x258   :  { %2873 = vmatmul.mubr.msk.bf16.vlgmr.msra.gmra.mrb[44].mxu0 %vm1138_vm4, %v1081_v52 }
 0x259   :  { %2881 = vmatpush3.bf16.msra.mxu0 %v3555_v3 }
 0x25a   :  { %2882 = vmatprep.subr.bf16.mxu0 %v3104_v54 }
 0x25b   :  { %v891_v56 = vpop.f32.mrb[36].mxu1 }
 0x25c   :  { %v893_v57 = vpop.f32.mrb[37].mxu1 }
 0x25d   :  { %v894_v58 = vpop.f32.mrb[38].mxu1  ;;  %2883 = vmatpush3.bf16.msra.mxu0 %v3104_v54 }
 0x25e   :  { %v1082_v19 = vpack.c.bf16 %v894_v58, %v891_v56  ;;  %v896_v59 = vpop.f32.mrb[39].mxu1  ;;  %2892 = vmatprep.subr.bf16.mxu0 %v3105_v55 }
 0x260   :  { %2876 = vmatprep.mubr.msk.bf16.mxu0 %vm1138_vm4, %v1082_v19 }
 0x263   :  { %v899_v60 = vpop.f32.mrb[40].mxu1 }
 0x264   :  { %v901_v61 = vpop.f32.mrb[41].mxu1 }
 0x265   :  { %v902_v62 = vpop.f32.mrb[42].mxu1 }
 0x266   :  { %v1083_v63 = vpack.c.bf16 %v902_v62, %v899_v60  ;;  %v904_v0 = vpop.f32.mrb[43].mxu1  ;;  %v3110_v62 = vld [vmem:[%s3782_s4 + $0x68] sm:$0xff]  }
 0x268   :  { %2877 = vmatmul.mubr.msk.bf16.gmra.mrb[52].mxu0 %vm1138_vm4, %v1083_v63  ;;  %v1412_v6 = vrot.slane %v1083_v63, 4 }
 0x26b   :  { %v907_v1 = vpop.f32.mrb[44].mxu1 }
 0x26c   :  { %v909_v2 = vpop.f32.mrb[45].mxu1 }
 0x26d   :  { %v910_v3 = vpop.f32.mrb[46].mxu1 }
 0x26e   :  { %v1084_v4 = vpack.c.bf16 %v910_v3, %v907_v1  ;;  %v912_v5 = vpop.f32.mrb[47].mxu1  ;;  %v3111_v3 = vld [vmem:[%s3782_s4 + $0x70] sm:$0xff]  }
 0x270   :  { %v1413_v7 = vrot.slane %v1084_v4, 4 }
 0x272   :  { %v1414_v8 = vsel %vm1118_vm5, %v1412_v6, %v1413_v7 }
 0x273   :  { %v915_v9 = vpop.f32.mrb[48].mxu1  ;;  %2884 = vmatprep.mubr.msk.bf16.mxu0 %vm1138_vm4, %v1414_v8 }
 0x274   :  { %v917_v10 = vpop.f32.mrb[49].mxu1 }
 0x275   :  { %v918_v11 = vpop.f32.mrb[50].mxu1 }
 0x276   :  { %v1085_v12 = vpack.c.bf16 %v918_v11, %v915_v9  ;;  %v920_v13 = vpop.f32.mrb[51].mxu1 }
 0x278   :  { %v1415_v14 = vrot.slane %v1085_v12, 4 }
 0x27a   :  { %v1416_v16 = vsel %vm1118_vm5, %v1413_v7, %v1415_v14 }
 0x27b   :  { %v923_v18 = vpop.f32.mrb[52].mxu1  ;;  %2885 = vmatmul.mubr.msk.bf16.vlgmr.msra.gmra.mrb[44].mxu0 %vm1138_vm4, %v1416_v16 }
 0x27c   :  { %v925_v20 = vpop.f32.mrb[53].mxu1  ;;  %2893 = vmatpush3.bf16.msra.mxu0 %v3105_v55 }
 0x27d   :  { %v926_v21 = vpop.f32.mrb[54].mxu1  ;;  %2894 = vmatprep.subr.bf16.mxu0 %v3106_v15  ;;  %v3112_v20 = vld [vmem:[%s3782_s4 + $0x78] sm:$0xff]  }
 0x27e   :  { %v1086_v23 = vpack.c.bf16 %v926_v21, %v923_v18  ;;  %v928_v24 = vpop.f32.mrb[55].mxu1  ;;  %v3113_v21 = vld [vmem:[%s3782_s4 + $0x80] sm:$0xff]  }
 0x280   :  { %v1417_v25 = vrot.slane %v1086_v23, 4  ;;  %2895 = vmatpush3.bf16.msra.mxu0 %v3106_v15 }
 0x281   :  { %2904 = vmatprep.subr.bf16.mxu0 %v3107_v22 }
 0x282   :  { %v1418_v26 = vsel %vm1118_vm5, %v1415_v14, %v1417_v25 }
 0x283   :  { %v931_v27 = vpop.f32.mrb[56].mxu1  ;;  %2888 = vmatprep.mubr.msk.bf16.mxu0 %vm1138_vm4, %v1418_v26 }
 0x284   :  { %v933_v28 = vpop.f32.mrb[57].mxu1  ;;  %2889 = vmatmul.mubr.msk.bf16.gmra.mrb[56].mxu0 %vm1138_vm4, %v1417_v25 }
 0x285   :  { %v934_v29 = vpop.f32.mrb[58].mxu1 }
 0x286   :  { %v1087_v30 = vpack.c.bf16 %v934_v29, %v931_v27  ;;  %v936_v31 = vpop.f32.mrb[59].mxu1 }
 0x288   :  { %2896 = vmatprep.mubr.msk.bf16.mxu0 %vm1138_vm4, %v1087_v30 }
 0x28b   :  { %v939_v32 = vpop.f32.mrb[60].mxu1 }
 0x28c   :  { %v941_v33 = vpop.f32.mrb[61].mxu1 }
 0x28d   :  { %v942_v34 = vpop.f32.mrb[62].mxu1 }
 0x28e   :  { %v1088_v35 = vpack.c.bf16 %v942_v34, %v939_v32  ;;  %v944_v36 = vpop.f32.mrb[63].mxu1 }
 0x290   :  { %2897 = vmatmul.mubr.msk.bf16.vlgmr.msra.gmra.mrb[44].mxu0 %vm1138_vm4, %v1088_v35 }
 0x291   :  { %2905 = vmatpush3.bf16.msra.mxu0 %v3107_v22 }
 0x292   :  { %2906 = vmatprep.subr.bf16.mxu0 %v3108_v37 }
 0x293   :  { %v947_v39 = vpop.f32.mrb[64].mxu1 }
 0x294   :  { %v949_v40 = vpop.f32.mrb[65].mxu1 }
 0x295   :  { %v950_v41 = vpop.f32.mrb[66].mxu1  ;;  %2907 = vmatpush3.bf16.msra.mxu0 %v3108_v37 }
 0x296   :  { %v1089_v42 = vpack.c.bf16 %v950_v41, %v947_v39  ;;  %v952_v43 = vpop.f32.mrb[67].mxu1  ;;  %2916 = vmatprep.subr.bf16.mxu0 %v3109_v38 }
 0x298   :  { %2900 = vmatprep.mubr.msk.bf16.mxu0 %vm1138_vm4, %v1089_v42 }
 0x29b   :  { %v955_v44 = vpop.f32.mrb[68].mxu1 }
 0x29c   :  { %v957_v45 = vpop.f32.mrb[69].mxu1 }
 0x29d   :  { %v958_v46 = vpop.f32.mrb[70].mxu1 }
 0x29e   :  { %v1090_v47 = vpack.c.bf16 %v958_v46, %v955_v44  ;;  %v960_v48 = vpop.f32.mrb[71].mxu1  ;;  %v3114_v46 = vld [vmem:[%s3782_s4 + $0x88] sm:$0xff]  }
 0x2a0   :  { %2901 = vmatmul.mubr.msk.bf16.gmra.mrb[60].mxu0 %vm1138_vm4, %v1090_v47  ;;  %v1623_v54 = vrot.slane %v1090_v47, 4 }
 0x2a3   :  { %v963_v49 = vpop.f32.mrb[72].mxu1 }
 0x2a4   :  { %v965_v50 = vpop.f32.mrb[73].mxu1 }
 0x2a5   :  { %v966_v51 = vpop.f32.mrb[74].mxu1 }
 0x2a6   :  { %v1091_v52 = vpack.c.bf16 %v966_v51, %v963_v49  ;;  %v968_v53 = vpop.f32.mrb[75].mxu1 }
 0x2a8   :  { %v1624_v55 = vrot.slane %v1091_v52, 4 }
 0x2aa   :  { %v1625_v56 = vsel %vm1118_vm5, %v1623_v54, %v1624_v55 }
 0x2ab   :  { %v971_v57 = vpop.f32.mrb[76].mxu1  ;;  %2908 = vmatprep.mubr.msk.bf16.mxu0 %vm1138_vm4, %v1625_v56 }
 0x2ac   :  { %v973_v58 = vpop.f32.mrb[77].mxu1 }
 0x2ad   :  { %v974_v19 = vpop.f32.mrb[78].mxu1 }
 0x2ae   :  { %v1092_v59 = vpack.c.bf16 %v974_v19, %v971_v57  ;;  %v976_v60 = vpop.f32.mrb[79].mxu1 }
 0x2b0   :  { %v1626_v61 = vrot.slane %v1092_v59, 4 }
 0x2b2   :  { %v1627_v63 = vsel %vm1118_vm5, %v1624_v55, %v1626_v61 }
 0x2b3   :  { %v979_v0 = vpop.f32.mrb[80].mxu1  ;;  %2909 = vmatmul.mubr.msk.bf16.vlgmr.msra.gmra.mrb[44].mxu0 %vm1138_vm4, %v1627_v63 }
 0x2b4   :  { %v981_v1 = vpop.f32.mrb[81].mxu1  ;;  %2917 = vmatpush3.bf16.msra.mxu0 %v3109_v38 }
 0x2b5   :  { %v982_v2 = vpop.f32.mrb[82].mxu1  ;;  %2918 = vmatprep.subr.bf16.mxu0 %v3110_v62 }
 0x2b6   :  { %v1093_v4 = vpack.c.bf16 %v982_v2, %v979_v0  ;;  %v984_v5 = vpop.f32.mrb[83].mxu1 }
 0x2b8   :  { %v1628_v6 = vrot.slane %v1093_v4, 4  ;;  %2919 = vmatpush3.bf16.msra.mxu0 %v3110_v62 }
 0x2b9   :  { %2928 = vmatprep.subr.bf16.mxu0 %v3111_v3 }
 0x2ba   :  { %v1629_v7 = vsel %vm1118_vm5, %v1626_v61, %v1628_v6 }
 0x2bb   :  { %v987_v8 = vpop.f32.mrb[84].mxu1  ;;  %2912 = vmatprep.mubr.msk.bf16.mxu0 %vm1138_vm4, %v1629_v7 }
 0x2bc   :  { %v989_v9 = vpop.f32.mrb[85].mxu1  ;;  %2913 = vmatmul.mubr.msk.bf16.gmra.mrb[64].mxu0 %vm1138_vm4, %v1628_v6 }
 0x2bd   :  { %v990_v10 = vpop.f32.mrb[86].mxu1 }
 0x2be   :  { %v1094_v11 = vpack.c.bf16 %v990_v10, %v987_v8  ;;  %v992_v12 = vpop.f32.mrb[87].mxu1 }
 0x2c0   :  { %2920 = vmatprep.mubr.msk.bf16.mxu0 %vm1138_vm4, %v1094_v11 }
 0x2c3   :  { %v995_v13 = vpop.f32.mrb[88].mxu1 }
 0x2c4   :  { %v997_v14 = vpop.f32.mrb[89].mxu1 }
 0x2c5   :  { %v998_v15 = vpop.f32.mrb[90].mxu1 }
 0x2c6   :  { %v1095_v16 = vpack.c.bf16 %v998_v15, %v995_v13  ;;  %v1000_v18 = vpop.f32.mrb[91].mxu1 }
 0x2c8   :  { %2921 = vmatmul.mubr.msk.bf16.vlgmr.msra.gmra.mrb[44].mxu0 %vm1138_vm4, %v1095_v16 }
 0x2c9   :  { %2929 = vmatpush3.bf16.msra.mxu0 %v3111_v3 }
 0x2ca   :  { %2930 = vmatprep.subr.bf16.mxu0 %v3112_v20 }
 0x2cb   :  { %v1003_v22 = vpop.f32.mrb[92].mxu1 }
 0x2cc   :  { %v1005_v23 = vpop.f32.mrb[93].mxu1 }
 0x2cd   :  { %v1006_v24 = vpop.f32.mrb[94].mxu1  ;;  %2931 = vmatpush3.bf16.msra.mxu0 %v3112_v20 }
 0x2ce   :  { %v1096_v25 = vpack.c.bf16 %v1006_v24, %v1003_v22  ;;  %v1008_v26 = vpop.f32.mrb[95].mxu1  ;;  %2940 = vmatprep.subr.bf16.mxu0 %v3113_v21 }
 0x2d0   :  { %2924 = vmatprep.mubr.msk.bf16.mxu0 %vm1138_vm4, %v1096_v25 }
 0x2d3   :  { %v1011_v27 = vpop.f32.mrb[96].mxu1 }
 0x2d4   :  { %v1013_v28 = vpop.f32.mrb[97].mxu1 }
 0x2d5   :  { %v1014_v29 = vpop.f32.mrb[98].mxu1 }
 0x2d6   :  { %v1097_v30 = vpack.c.bf16 %v1014_v29, %v1011_v27  ;;  %v1016_v31 = vpop.f32.mrb[99].mxu1 }
 0x2d8   :  { %2925 = vmatmul.mubr.msk.bf16.gmra.mrb[68].mxu0 %vm1138_vm4, %v1097_v30  ;;  %v1834_v37 = vrot.slane %v1097_v30, 4 }
 0x2db   :  { %v1019_v32 = vpop.f32.mrb[100].mxu1 }
 0x2dc   :  { %v1021_v33 = vpop.f32.mrb[101].mxu1 }
 0x2dd   :  { %v1022_v34 = vpop.f32.mrb[102].mxu1 }
 0x2de   :  { %v1098_v35 = vpack.c.bf16 %v1022_v34, %v1019_v32  ;;  %v1024_v36 = vpop.f32.mrb[103].mxu1  ;;  %v3115_v34 = vld [vmem:[%s3783_s6] ss:$8 sps:$4 sm:$0xff]  }
 0x2e0   :  { %v1835_v38 = vrot.slane %v1098_v35, 4  ;;  %v3117_v35 = vld [vmem:[%s3783_s6 + $0x4] ss:$8 sps:$4 sm:$0xff]  }
 0x2e2   :  { %v1836_v39 = vsel %vm1118_vm5, %v1834_v37, %v1835_v38 }
 0x2e3   :  { %v1027_v40 = vpop.f32.mrb[104].mxu1  ;;  %2932 = vmatprep.mubr.msk.bf16.mxu0 %vm1138_vm4, %v1836_v39 }
 0x2e4   :  { %v1029_v41 = vpop.f32.mrb[105].mxu1 }
 0x2e5   :  { %v1030_v42 = vpop.f32.mrb[106].mxu1  ;;  %v3120_v41 = vld [vmem:[%s3783_s6 + $0x14] ss:$8 sps:$4 sm:$0xff]  }
 0x2e6   :  { %v1099_v43 = vpack.c.bf16 %v1030_v42, %v1027_v40  ;;  %v1032_v44 = vpop.f32.mrb[107].mxu1 }
 0x2e8   :  { %v1837_v45 = vrot.slane %v1099_v43, 4  ;;  %v3118_v43 = vld [vmem:[%s3783_s6 + $0x10] ss:$8 sps:$4 sm:$0xff]  }
 0x2ea   :  { %v1838_v47 = vsel %vm1118_vm5, %v1835_v38, %v1837_v45 }
 0x2eb   :  { %v1035_v48 = vpop.f32.mrb[108].mxu1  ;;  %2933 = vmatmul.mubr.msk.bf16.vlgmr.msra.gmra.mrb[44].mxu0 %vm1138_vm4, %v1838_v47 }
 0x2ec   :  { %v1037_v49 = vpop.f32.mrb[109].mxu1  ;;  %2941 = vmatpush3.bf16.msra.mxu0 %v3113_v21 }
 0x2ed   :  { %v1038_v50 = vpop.f32.mrb[110].mxu1  ;;  %2942 = vmatprep.subr.bf16.mxu0 %v3114_v46 }
 0x2ee   :  { %v1100_v51 = vpack.c.bf16 %v1038_v50, %v1035_v48  ;;  %v1040_v52 = vpop.f32.mrb[111].mxu1 }
 0x2f0   :  { %v1839_v53 = vrot.slane %v1100_v51, 4  ;;  %2943 = vmatpush3.bf16.msra.mxu0 %v3114_v46 }
 0x2f1   :  { %2109 = vmatprep.subr.bf16.mxu0 %v3117_v35 }
 0x2f2   :  { %v1840_v54 = vsel %vm1118_vm5, %v1837_v45, %v1839_v53 }
 0x2f3   :  { %v1043_v55 = vpop.f32.mrb[112].mxu1  ;;  %2936 = vmatprep.mubr.msk.bf16.mxu0 %vm1138_vm4, %v1840_v54 }
 0x2f4   :  { %v1045_v56 = vpop.f32.mrb[113].mxu1  ;;  %2937 = vmatmul.mubr.msk.bf16.gmra.mrb[72].mxu0 %vm1138_vm4, %v1839_v53 }
 0x2f5   :  { %v1046_v57 = vpop.f32.mrb[114].mxu1 }
 0x2f6   :  { %v1101_v58 = vpack.c.bf16 %v1046_v57, %v1043_v55  ;;  %v1048_v19 = vpop.f32.mrb[115].mxu1 }
 0x2f8   :  { %2944 = vmatprep.mubr.msk.bf16.mxu0 %vm1138_vm4, %v1101_v58 }
 0x2fb   :  { %v1051_v59 = vpop.f32.mrb[116].mxu1 }
 0x2fc   :  { %v1053_v60 = vpop.f32.mrb[117].mxu1 }
 0x2fd   :  { %v1054_v61 = vpop.f32.mrb[118].mxu1 }
 0x2fe   :  { %v1102_v62 = vpack.c.bf16 %v1054_v61, %v1051_v59  ;;  %v1056_v63 = vpop.f32.mrb[119].mxu1 }
 0x300   :  { %2945 = vmatmul.mubr.msk.bf16.vlgmr.msra.gmra.mrb[44].mxu0 %vm1138_vm4, %v1102_v62 }
 0x301   :  { %2110 = vmatpush1.bf16.msra.mxu0 %v3115_v34 }
 0x302   :  { %2111 = vmatprep.subr.bf16.mxu0 %v3120_v41  ;;  %v3124_v41 = vld [vmem:[%s3784_s8 + $0x18] sm:$0xff]  }
 0x303   :  { %v1059_v0 = vpop.f32.mrb[120].mxu1  ;;  %v2866_v1 = vpop.f32.mrb[48].mxu0 }
 0x304   :  { %v1061_v2 = vpop.f32.mrb[121].mxu1  ;;  %v1289_v3 = vpop.f32.mrb[49].mxu0 }
 0x305   :  { %v1062_v4 = vpop.f32.mrb[122].mxu1  ;;  %v2867_v5 = vpop.f32.mrb[50].mxu0  ;;  %2112 = vmatpush1.bf16.msra.mxu0 %v3118_v43 }
 0x306   :  { %v1103_v6 = vpack.c.bf16 %v1062_v4, %v1059_v0  ;;  %v1064_v7 = vpop.f32.mrb[123].mxu1  ;;  %v1292_v8 = vpop.f32.mrb[51].mxu0  ;;  %2326 = vmatprep.subr.bf16.mxu0 %v3164_v17 }
 0x308   :  { %2948 = vmatprep.mubr.msk.bf16.mxu0 %vm1138_vm4, %v1103_v6 }
 0x30b   :  { %v1067_v9 = vpop.f32.mrb[124].mxu1 }
 0x30c   :  { %v1104_v10 = vpack.c.bf16 %v1067_v9, %v1067_v9  ;;  %v1069_v11 = vpop.f32.mrb[125].mxu1  ;;  %v2682_v9 = vld [vmem:[%s3785_s5] ss:$0 sm:$0xff] }
 0x30d   :  { %v1070_v12 = vpop.f32.mrb[126].mxu1 }
 0x30e   :  { %v1071_v13 = vpop.f32.mrb[127].mxu1  ;;  %2949 = vmatmul.mubr.msk.bf16.gmra.mrb[76].mxu0 %vm1138_vm4, %v1104_v10 }
 0x30f   :  { %2141 = vmatprep.mubr.bf16.mxu0 %v3164_v17 }
 0x316   :  { %v3653_v14 = vpop.f32.mrb[128].mxu1 }
 0x317   :  { %v3655_v15 = vpop.f32.mrb[129].mxu1 }
 0x318   :  { %v3657_v16 = vpop.f32.mrb[130].mxu1 }
 0x319   :  { %v3659_v18 = vpop.f32.mrb[131].mxu1 }
 0x31f   :  { %v2854_v20 = vpop.f32.mrb[132].mxu1 }
 0x320   :  { %v1298_v21 = vadd.f32 %v2866_v1, %v2854_v20  ;;  %v1201_v22 = vpop.f32.mrb[133].mxu1 }
 0x321   :  { %v1290_v23 = vadd.f32 %v1289_v3, %v1201_v22  ;;  %v2855_v24 = vpop.f32.mrb[134].mxu1 }
 0x322   :  { %v1204_v25 = vpop.f32.mrb[135].mxu1 }
 0x323   :  { %v1293_v26 = vadd.f32 %v1292_v8, %v1204_v25 }
 0x33b   :  { %v2878_v27 = vpop.f32.mrb[52].mxu0 }
 0x33c   :  { %v1402_v28 = vadd.f32 %v2878_v27, %v1298_v21  ;;  %v1382_v29 = vpop.f32.mrb[53].mxu0 }
 0x33d   :  { %v1400_v30 = vadd.f32 %v1382_v29, %v1290_v23  ;;  %v2879_v31 = vpop.f32.mrb[54].mxu0 }
 0x33e   :  { %v1385_v32 = vpop.f32.mrb[55].mxu0 }
 0x33f   :  { %v1401_v33 = vadd.f32 %v1385_v32, %v1293_v26 }
 0x357   :  { %v2890_v36 = vpop.f32.mrb[56].mxu0 }
 0x358   :  { %v1513_v37 = vadd.f32 %v2890_v36, %v1402_v28  ;;  %v1493_v38 = vpop.f32.mrb[57].mxu0 }
 0x359   :  { %v1511_v39 = vadd.f32 %v1493_v38, %v1400_v30  ;;  %v2891_v40 = vpop.f32.mrb[58].mxu0 }
 0x35a   :  { %v1496_v42 = vpop.f32.mrb[59].mxu0 }
 0x35b   :  { %v1512_v44 = vadd.f32 %v1496_v42, %v1401_v33 }
 0x373   :  { %v2902_v45 = vpop.f32.mrb[60].mxu0 }
 0x374   :  { %v1613_v46 = vadd.f32 %v2902_v45, %v1513_v37  ;;  %v1593_v47 = vpop.f32.mrb[61].mxu0  ;;  %v3123_v37 = vld [vmem:[%s3784_s8 + $0x10] sm:$0xff]   ;;  %v3125_v45 = vld [vmem:[%s3784_s8 + $0x20] sm:$0xff]  }
 0x375   :  { %v1611_v48 = vadd.f32 %v1593_v47, %v1511_v39  ;;  %v2903_v49 = vpop.f32.mrb[62].mxu0  ;;  %v3126_v47 = vld [vmem:[%s3784_s8 + $0x28] sm:$0xff]  }
 0x376   :  { %v1596_v50 = vpop.f32.mrb[63].mxu0  ;;  %v3127_v49 = vld [vmem:[%s3784_s8 + $0x30] sm:$0xff]  }
 0x377   :  { %v1612_v51 = vadd.f32 %v1596_v50, %v1512_v44 }
 0x38f   :  { %v2914_v52 = vpop.f32.mrb[64].mxu0 }
 0x390   :  { %v1724_v53 = vadd.f32 %v2914_v52, %v1613_v46  ;;  %v1704_v54 = vpop.f32.mrb[65].mxu0  ;;  %v3129_v52 = vld [vmem:[%s3784_s8 + $0x40] sm:$0xff]  }
 0x391   :  { %v1722_v55 = vadd.f32 %v1704_v54, %v1611_v48  ;;  %v2915_v56 = vpop.f32.mrb[66].mxu0  ;;  %v3131_v54 = vld [vmem:[%s3784_s8 + $0x50] sm:$0xff]  }
 0x392   :  { %v1707_v57 = vpop.f32.mrb[67].mxu0  ;;  %v3133_v56 = vld [vmem:[%s3784_s8 + $0x60] ss:$0 sps:$4 sm:$0xff]  }
 0x393   :  { %v1723_v58 = vadd.f32 %v1707_v57, %v1612_v51  ;;  %v3128_v51 = vld [vmem:[%s3784_s8 + $0x38] sm:$0xff]   ;;  %v2324_v57 = vsel %vm1118_vm5, %v3133_v56, 0 }
 0x3ab   :  { %v2926_v19 = vpop.f32.mrb[68].mxu0 }
 0x3ac   :  { %v1824_v59 = vadd.f32 %v2926_v19, %v1724_v53  ;;  %v1804_v60 = vpop.f32.mrb[69].mxu0  ;;  %v3130_v53 = vld [vmem:[%s3784_s8 + $0x48] sm:$0xff]  }
 0x3ad   :  { %v1822_v61 = vadd.f32 %v1804_v60, %v1722_v55  ;;  %v2927_v62 = vpop.f32.mrb[70].mxu0  ;;  %v3132_v55 = vld [vmem:[%s3784_s8 + $0x58] sm:$0xff]   ;;  %v2065_v60 = vld [vmem:[%s3786_s7] sm:$0x3] }
 0x3ae   :  { %v1807_v63 = vpop.f32.mrb[71].mxu0 }
 0x3af   :  { %v1823_v0 = vadd.f32 %v1807_v63, %v1723_v58  ;;  %v2067_v58 = vlaneseq }
 0x3b1   :  { %v2068_v19 = vshrl.u32 %v2067_v58, 7 }
 0x3c7   :  { %v2938_v1 = vpop.f32.mrb[72].mxu0 }
 0x3c8   :  { %v1935_v2 = vadd.f32 %v2938_v1, %v1824_v59  ;;  %v1915_v3 = vpop.f32.mrb[73].mxu0  ;;  %v2069_v59 = vsub.s32 0, %v2068_v19 }
 0x3c9   :  { %v1933_v4 = vadd.f32 %v1915_v3, %v1822_v61  ;;  %v2939_v5 = vpop.f32.mrb[74].mxu0  ;;  %v2073_v61 = vsub.s32 1, %v2068_v19 }
 0x3ca   :  { %v1918_v6 = vpop.f32.mrb[75].mxu0  ;;  %v2070_v62 = vrot.slane %v2065_v60, %v2069_v59 }
 0x3cb   :  { %v1934_v7 = vadd.f32 %v1918_v6, %v1823_v0  ;;  %v2074_v63 = vrot.slane %v2065_v60, %v2073_v61 }
 0x3d3   :  { %v2946_v8 = vpop.f32.mrb[44].mxu0 }
 0x3d4   :  { %v2952_v10 = vadd.f32 %v2946_v8, %v3653_v14  ;;  %v1999_v11 = vpop.f32.mrb[45].mxu0  ;;  %v3121_v14 = vld [vmem:[%s3784_s8] sm:$0xff]  }
 0x3d5   :  { %v2953_v12 = vadd.f32 %v1999_v11, %v3655_v15  ;;  %v2947_v13 = vpop.f32.mrb[46].mxu0 }
 0x3d6   :  { %v2045_v20 = vadd.f32 %v2952_v10, %v2682_v9  ;;  %v2954_v21 = vadd.f32 %v2947_v13, %v3657_v16  ;;  %v2002_v22 = vpop.f32.mrb[47].mxu0  ;;  %v3122_v16 = vld [vmem:[%s3784_s8 + $0x8] sm:$0xff]  }
 0x3d7   :  { %v2043_v23 = vadd.f32 %v2953_v12, %v2682_v9  ;;  %v2955_v24 = vadd.f32 %v2002_v22, %v3659_v18 }
 0x3d8   :  { %v2046_v25 = vadd.f32 %v2954_v21, %v2682_v9  ;;  %v2052_v27 = vmax.f32 %v2045_v20, 0.0 }
 0x3d9   :  { %v2044_v26 = vadd.f32 %v2955_v24, %v2682_v9  ;;  %v2050_v29 = vmax.f32 %v2043_v23, 0.0 }
 0x3da   :  { %v2053_v28 = vmax.f32 %v2046_v25, 0.0 }
 0x3db   :  { %v2051_v30 = vmax.f32 %v2044_v26, 0.0 }
 0x3dc   :  { %v2058_v31 = vpack.c.bf16 %v2053_v28, %v2052_v27 }
 0x3dd   :  { %v2057_v15 = vpack.c.bf16 %v2051_v30, %v2050_v29 }
 0x3df   :  { %2687 = vmatmul.mubr.msk.bf16.vlgmr.msra.gmra.mrb[80].mxu0 %vm1138_vm4, %v2057_v15 }
 0x3e0   :  { %2151 = vmatprep.mubr.bf16.mxu0 %v3164_v17  ;;  %2327 = vmatpush1.bf16.msra.mxu0 %v3121_v14 }
 0x3e1   :  { %v2950_v18 = vpop.f32.mrb[76].mxu0  ;;  %2328 = vmatprep.subr.bf16.mxu0 %v3164_v17 }
 0x3e2   :  { %v2035_v32 = vadd.f32 %v2950_v18, %v1935_v2  ;;  %v2015_v33 = vpop.f32.mrb[77].mxu0 }
 0x3e3   :  { %v2033_v34 = vadd.f32 %v2015_v33, %v1933_v4  ;;  %v2951_v35 = vpop.f32.mrb[78].mxu0 }
 0x3e4   :  { %v2018_v36 = vpop.f32.mrb[79].mxu0  ;;  %2329 = vmatpush1.bf16.msra.mxu0 %v3122_v16  ;;  %v2049_v46 = vadd.f32 %v2682_v9, %v2035_v32 }
 0x3e5   :  { %v2047_v38 = vadd.f32 %v2682_v9, %v2033_v34  ;;  %v2034_v39 = vadd.f32 %v2018_v36, %v1934_v7  ;;  %2330 = vmatprep.subr.bf16.mxu0 %v3164_v17 }
 0x3e6   :  { %v2056_v48 = vmax.f32 %v2049_v46, 0.0 }
 0x3e7   :  { %v2048_v40 = vadd.f32 %v2682_v9, %v2034_v39  ;;  %2688 = vmatmul.mubr.msk.bf16.gmra.mrb[84].mxu0 %vm1138_vm4, %v2058_v31  ;;  %v2054_v42 = vmax.f32 %v2047_v38, 0.0 }
 0x3e8   :  { %2161 = vmatprep.mubr.bf16.mxu0 %v3164_v17  ;;  %2331 = vmatpush1.bf16.msra.mxu0 %v3123_v37  ;;  %v2060_v50 = vpack.c.bf16 %v2056_v48, %v2056_v48 }
 0x3e9   :  { %v2055_v43 = vmax.f32 %v2048_v40, 0.0  ;;  %2332 = vmatprep.subr.bf16.mxu0 %v3164_v17 }
 0x3eb   :  { %v2059_v44 = vpack.c.bf16 %v2055_v43, %v2054_v42 }
 0x3ec   :  { %2333 = vmatpush1.bf16.msra.mxu0 %v3124_v41 }
 0x3ed   :  { %2334 = vmatprep.subr.bf16.mxu0 %v3164_v17 }
 0x3ef   :  { %2689 = vmatmul.mubr.msk.bf16.gmra.mrb[88].mxu0 %vm1138_vm4, %v2059_v44 }
 0x3f0   :  { %2171 = vmatprep.mubr.bf16.mxu0 %v3164_v17  ;;  %2335 = vmatpush1.bf16.msra.mxu0 %v3125_v45 }
 0x3f1   :  { %2336 = vmatprep.subr.bf16.mxu0 %v3164_v17 }
 0x3f4   :  { %2337 = vmatpush1.bf16.msra.mxu0 %v3126_v47 }
 0x3f5   :  { %2338 = vmatprep.subr.bf16.mxu0 %v3164_v17 }
 0x3f7   :  { %2690 = vmatmul.mubr.msk.bf16.gmra.mrb[92].mxu0 %vm1138_vm4, %v2060_v50 }
 0x3f8   :  { %2339 = vmatpush1.bf16.msra.mxu0 %v3127_v49 }
 0x3f9   :  { %2340 = vmatprep.subr.bf16.mxu0 %v3164_v17 }
 0x3fc   :  { %2341 = vmatpush1.bf16.msra.mxu0 %v3128_v51 }
 0x3fd   :  { %2342 = vmatprep.subr.bf16.mxu0 %v3164_v17 }
 0x400   :  { %2343 = vmatpush1.bf16.msra.mxu0 %v3129_v52 }
 0x401   :  { %2344 = vmatprep.subr.bf16.mxu0 %v3164_v17 }
 0x404   :  { %2345 = vmatpush1.bf16.msra.mxu0 %v3130_v53  ;;  %v2691_v53 = vld [vmem:[%s3787_s9] ss:$0 sm:$0xff] }
 0x405   :  { %2346 = vmatprep.subr.bf16.mxu0 %v3164_v17 }
 0x408   :  { %2347 = vmatpush1.bf16.msra.mxu0 %v3131_v54 }
 0x409   :  { %2348 = vmatprep.subr.bf16.mxu0 %v3164_v17 }
 0x40c   :  { %2349 = vmatpush1.bf16.msra.mxu0 %v3132_v55 }
 0x40d   :  { %2350 = vmatprep.subr.bf16.mxu0 %v3164_v17 }
 0x410   :  { %2351 = vmatpush1.bf16.msra.mxu0 %v2324_v57 }
 0x4b2   :  { %v2143_v0 = vpop.f32.mrb[80].mxu0 }
 0x4b3   :  { %v2144_v1 = vadd.f32 %v2143_v0, %v2070_v62  ;;  %v2145_v17 = vpop.f32.mrb[81].mxu0 }
 0x4b4   :  { %v2146_v2 = vadd.f32 %v2145_v17, %v2074_v63  ;;  %v2147_v3 = vpop.f32.mrb[82].mxu0 }
 0x4b5   :  { %v2148_v4 = vadd.f32 %v2147_v3, %v2070_v62  ;;  %v2149_v5 = vpop.f32.mrb[83].mxu0  ;;  %v2180_v7 = vmax.f32 %v2144_v1, 0.0 }
 0x4b6   :  { %v2150_v6 = vadd.f32 %v2149_v5, %v2074_v63  ;;  %v2181_v9 = vmax.f32 %v2146_v2, 0.0 }
 0x4b7   :  { %v2182_v8 = vmax.f32 %v2148_v4, 0.0 }
 0x4b8   :  { %v2183_v10 = vmax.f32 %v2150_v6, 0.0 }
 0x4b9   :  { %v2194_v11 = vpack.c.bf16 %v2182_v8, %v2180_v7 }
 0x4ba   :  { %v2195_v12 = vpack.c.bf16 %v2183_v10, %v2181_v9  ;;  %v2153_v13 = vpop.f32.mrb[84].mxu0 }
 0x4bb   :  { %v2154_v20 = vadd.f32 %v2153_v13, %v2070_v62  ;;  %v2155_v21 = vpop.f32.mrb[85].mxu0 }
 0x4bc   :  { %v2156_v22 = vadd.f32 %v2155_v21, %v2074_v63  ;;  %v2157_v23 = vpop.f32.mrb[86].mxu0  ;;  %2705 = vmatprep.mubr.msk.bf16.mxu0 %vm2309_vm6, %v2195_v12 }
 0x4bd   :  { %v2158_v24 = vadd.f32 %v2157_v23, %v2070_v62  ;;  %v2159_v25 = vpop.f32.mrb[87].mxu0  ;;  %2359 = vmatmul.mubr.bf16.vlgmr.msra.gmra.mrb[96].mxu0 %v2194_v11  ;;  %v2184_v27 = vmax.f32 %v2154_v20, 0.0 }
 0x4be   :  { %v2160_v26 = vadd.f32 %v2159_v25, %v2074_v63  ;;  %v2185_v29 = vmax.f32 %v2156_v22, 0.0 }
 0x4bf   :  { %v2186_v28 = vmax.f32 %v2158_v24, 0.0 }
 0x4c0   :  { %v2187_v30 = vmax.f32 %v2160_v26, 0.0 }
 0x4c1   :  { %v2196_v31 = vpack.c.bf16 %v2186_v28, %v2184_v27 }
 0x4c2   :  { %v2197_v14 = vpack.c.bf16 %v2187_v30, %v2185_v29  ;;  %v2163_v15 = vpop.f32.mrb[88].mxu0 }
 0x4c3   :  { %v2164_v16 = vadd.f32 %v2163_v15, %v2070_v62  ;;  %v2165_v18 = vpop.f32.mrb[89].mxu0 }
 0x4c4   :  { %v2166_v32 = vadd.f32 %v2165_v18, %v2074_v63  ;;  %v2167_v33 = vpop.f32.mrb[90].mxu0  ;;  %2706 = vmatprep.mubr.msk.bf16.mxu0 %vm2309_vm6, %v2197_v14 }
 0x4c5   :  { %v2168_v34 = vadd.f32 %v2167_v33, %v2070_v62  ;;  %v2169_v35 = vpop.f32.mrb[91].mxu0  ;;  %2367 = vmatmul.mubr.bf16.gmra.mrb[100].mxu0 %v2196_v31  ;;  %v2188_v37 = vmax.f32 %v2164_v16, 0.0 }
 0x4c6   :  { %v2170_v36 = vadd.f32 %v2169_v35, %v2074_v63  ;;  %v2189_v39 = vmax.f32 %v2166_v32, 0.0 }
 0x4c7   :  { %v2190_v38 = vmax.f32 %v2168_v34, 0.0 }
 0x4c8   :  { %v2191_v40 = vmax.f32 %v2170_v36, 0.0 }
 0x4c9   :  { %v2198_v41 = vpack.c.bf16 %v2190_v38, %v2188_v37 }
 0x4ca   :  { %v2199_v42 = vpack.c.bf16 %v2191_v40, %v2189_v39  ;;  %v2173_v43 = vpop.f32.mrb[92].mxu0 }
 0x4cb   :  { %v2174_v44 = vadd.f32 %v2173_v43, %v2070_v62  ;;  %v2175_v45 = vpop.f32.mrb[93].mxu0 }
 0x4cc   :  { %v2176_v46 = vadd.f32 %v2175_v45, %v2074_v63  ;;  %v2177_v47 = vpop.f32.mrb[94].mxu0  ;;  %2707 = vmatprep.mubr.msk.bf16.mxu0 %vm2309_vm6, %v2199_v42 }
 0x4cd   :  { %v2178_v48 = vpop.f32.mrb[95].mxu0  ;;  %2375 = vmatmul.mubr.bf16.gmra.mrb[104].mxu0 %v2198_v41  ;;  %v2192_v50 = vmax.f32 %v2174_v44, 0.0 }
 0x4ce   :  { %v2193_v49 = vmax.f32 %v2176_v46, 0.0 }
 0x4cf   :  { %v2200_v52 = vpack.c.bf16 %v2192_v50, %v2192_v50 }
 0x4d0   :  { %v2201_v51 = vpack.c.bf16 %v2193_v49, %v2193_v49 }
 0x4d2   :  { %2708 = vmatprep.mubr.msk.bf16.mxu0 %vm2309_vm6, %v2201_v51 }
 0x4d5   :  { %2383 = vmatmul.mubr.bf16.gmra.mrb[108].mxu0 %v2200_v52 }
 0x590   :  { %v2360_v54 = vpop.f32.mrb[96].mxu0 }
 0x591   :  { %v2361_v55 = vadd.f32 %v2691_v53, %v2360_v54  ;;  %v2362_v56 = vpop.f32.mrb[97].mxu0 }
 0x592   :  { %v2363_v57 = vpop.f32.mrb[98].mxu0 }
 0x593   :  { %v2390_v58 = vmax.f32 %v2361_v55, 0.0  ;;  %v2364_v19 = vadd.f32 %v2691_v53, %v2363_v57  ;;  %v2365_v59 = vpop.f32.mrb[99].mxu0 }
 0x595   :  { %v2397_v60 = vsub.f32 0.0, %v2390_v58  ;;  %v2391_v61 = vmax.f32 %v2364_v19, 0.0 }
 0x597   :  { %v2404_v62 = vmul.f32 1.442695, %v2397_v60  ;;  %v2398_v63 = vsub.f32 0.0, %v2391_v61 }
 0x598   :  { %v2368_v0 = vpop.f32.mrb[100].mxu0 }
 0x599   :  { %3134 = vpow2.f32 %v2404_v62  ;;  %v2406_v1 = vmul.f32 1.442695, %v2398_v63  ;;  %v2369_v17 = vadd.f32 %v2691_v53, %v2368_v0  ;;  %v2370_v2 = vpop.f32.mrb[101].mxu0 }
 0x59a   :  { %v2371_v3 = vpop.f32.mrb[102].mxu0 }
 0x59b   :  { %3136 = vpow2.f32 %v2406_v1  ;;  %v2392_v4 = vmax.f32 %v2369_v17, 0.0  ;;  %v2372_v5 = vadd.f32 %v2691_v53, %v2371_v3  ;;  %v2373_v6 = vpop.f32.mrb[103].mxu0 }
 0x59d   :  { %v2399_v7 = vsub.f32 0.0, %v2392_v4  ;;  %v2393_v8 = vmax.f32 %v2372_v5, 0.0 }
 0x59f   :  { %v2408_v9 = vmul.f32 1.442695, %v2399_v7  ;;  %v2400_v10 = vsub.f32 0.0, %v2393_v8 }
 0x5a0   :  { %v2376_v11 = vpop.f32.mrb[104].mxu0 }
 0x5a1   :  { %3138 = vpow2.f32 %v2408_v9  ;;  %v2410_v12 = vmul.f32 1.442695, %v2400_v10  ;;  %v2377_v13 = vadd.f32 %v2691_v53, %v2376_v11  ;;  %v2378_v20 = vpop.f32.mrb[105].mxu0 }
 0x5a2   :  { %v2379_v21 = vpop.f32.mrb[106].mxu0 }
 0x5a3   :  { %v3135_v22 = vpop.eup %3134  ;;  %3140 = vpow2.f32 %v2410_v12  ;;  %v2394_v23 = vmax.f32 %v2377_v13, 0.0  ;;  %v2380_v24 = vadd.f32 %v2691_v53, %v2379_v21  ;;  %v2381_v25 = vpop.f32.mrb[107].mxu0 }
 0x5a4   :  { %v2418_v26 = vadd.f32 1.0, %v3135_v22 }
 0x5a5   :  { %v3137_v27 = vpop.eup %3136  ;;  %v2401_v28 = vsub.f32 0.0, %v2394_v23  ;;  %v2395_v29 = vmax.f32 %v2380_v24, 0.0 }
 0x5a6   :  { %3142 = vrcp.f32 %v2418_v26  ;;  %v2419_v30 = vadd.f32 1.0, %v3137_v27 }
 0x5a7   :  { %v2412_v31 = vmul.f32 1.442695, %v2401_v28  ;;  %v2402_v14 = vsub.f32 0.0, %v2395_v29 }
 0x5a8   :  { %3144 = vrcp.f32 %v2419_v30  ;;  %v2384_v15 = vpop.f32.mrb[108].mxu0 }
 0x5a9   :  { %3146 = vpow2.f32 %v2412_v31  ;;  %v2414_v16 = vmul.f32 1.442695, %v2402_v14  ;;  %v2385_v18 = vadd.f32 %v2691_v53, %v2384_v15  ;;  %v2386_v32 = vpop.f32.mrb[109].mxu0 }
 0x5aa   :  { %v2387_v33 = vpop.f32.mrb[110].mxu0 }
 0x5ab   :  { %v3139_v34 = vpop.eup %3138  ;;  %3148 = vpow2.f32 %v2414_v16  ;;  %v2396_v35 = vmax.f32 %v2385_v18, 0.0  ;;  %v2388_v36 = vpop.f32.mrb[111].mxu0 }
 0x5ac   :  { %v2420_v37 = vadd.f32 1.0, %v3139_v34 }
 0x5ad   :  { %v3141_v38 = vpop.eup %3140  ;;  %v2403_v39 = vsub.f32 0.0, %v2396_v35 }
 0x5ae   :  { %3150 = vrcp.f32 %v2420_v37  ;;  %v2421_v40 = vadd.f32 1.0, %v3141_v38 }
 0x5af   :  { %v2416_v41 = vmul.f32 1.442695, %v2403_v39 }
 0x5b0   :  { %v3143_v42 = vpop.eup %3142  ;;  %3152 = vrcp.f32 %v2421_v40 }
 0x5b1   :  { %v2716_v43 = vpack.c.bf16 %v3143_v42, %v3143_v42  ;;  %3154 = vpow2.f32 %v2416_v41 }
 0x5b2   :  { %v3145_v44 = vpop.eup %3144 }
 0x5b3   :  { %v3147_v45 = vpop.eup %3146  ;;  %2462 = vst.msk [vmem:[%s3788_s10] sm:$0xf] %vm2461_vm7, %v2716_v43  ;;  %v2717_v46 = vpack.c.bf16 %v3145_v44, %v3145_v44 }
 0x5b4   :  { %v2422_v47 = vadd.f32 1.0, %v3147_v45 }
 0x5b5   :  { %v3149_v48 = vpop.eup %3148  ;;  %2463 = vst.msk [vmem:[%s3788_s10 + $0x4] sm:$0xf] %vm2461_vm7, %v2717_v46 }
 0x5b6   :  { %3156 = vrcp.f32 %v2422_v47  ;;  %v2423_v49 = vadd.f32 1.0, %v3149_v48 }
 0x5b8   :  { %v3151_v50 = vpop.eup %3150  ;;  %3158 = vrcp.f32 %v2423_v49 }
 0x5b9   :  { %v2718_v51 = vpack.c.bf16 %v3151_v50, %v3151_v50 }
 0x5ba   :  { %v3153_v52 = vpop.eup %3152 }
 0x5bb   :  { %v3155_v53 = vpop.eup %3154  ;;  %2464 = vst.msk [vmem:[%s3788_s10 + $0x8] sm:$0xf] %vm2461_vm7, %v2718_v51  ;;  %v2719_v54 = vpack.c.bf16 %v3153_v52, %v3153_v52 }
 0x5bc   :  { %v2424_v55 = vadd.f32 1.0, %v3155_v53 }
 0x5bd   :  { %2465 = vst.msk [vmem:[%s3788_s10 + $0xc] sm:$0xf] %vm2461_vm7, %v2719_v54 }
 0x5be   :  { %3160 = vrcp.f32 %v2424_v55 }
 0x5c0   :  { %v3157_v56 = vpop.eup %3156 }
 0x5c1   :  { %v2720_v57 = vpack.c.bf16 %v3157_v56, %v3157_v56 }
 0x5c2   :  { %v3159_v58 = vpop.eup %3158 }
 0x5c3   :  { %2466 = vst.msk [vmem:[%s3788_s10 + $0x10] sm:$0xf] %vm2461_vm7, %v2720_v57  ;;  %v2721_v19 = vpack.c.bf16 %v3159_v58, %v3159_v58 }
 0x5c5   :  { %2467 = vst.msk [vmem:[%s3788_s10 + $0x14] sm:$0xf] %vm2461_vm7, %v2721_v19 }
 0x5c8   :  { %v3161_v59 = vpop.eup %3160 }
 0x5c9   :  { %v2722_v60 = vpack.c.bf16 %v3161_v59, %v3161_v59 }
 0x5cb   :  { %2468 = vst.msk [vmem:[%s3788_s10 + $0x18] sm:$0xf] %vm2461_vm7, %v2722_v60 }

</bundles_post_ra>
